<compile_context>
chip_gen: v5e
topology: v5e:2x2
jax: 0.10.0
libtpu: 0.0.40
codegen_flags: <defaults>
</compile_context>

<pallas_src>
import math
from functools import partial

import jax
import jax.numpy as jnp
from jax.experimental import pallas as pl
from jax.experimental.pallas import tpu as pltpu


# ---------------------------------------------------------------------------
# Fused forward kernel (one grid step == full forward for one batch element)
# ---------------------------------------------------------------------------

def _make_forward_kernel(num_layers, num_heads, head_dim):
    scale = 1.0 / math.sqrt(head_dim)

    def kernel(x_ref, bias_ref,
               in_w_ref, in_b_ref,
               qkv_w_ref, qkv_b_ref,
               o_w_ref, o_b_ref,
               ln1_g_ref, ln1_b_ref,
               ff1_w_ref, ff1_b_ref,
               ff2_w_ref, ff2_b_ref,
               ln2_g_ref, ln2_b_ref,
               out_w_ref, out_b_ref,
               o_ref):
        x = x_ref[...]          # [S, F]  (one batch element)
        bias = bias_ref[...]    # [S, S]  (shared across heads)

        def layernorm(t, g, b):
            m = jnp.mean(t, axis=-1, keepdims=True)
            v = jnp.mean(jnp.square(t - m), axis=-1, keepdims=True)
            return (t - m) * jax.lax.rsqrt(v + 1e-5) * g + b

        # ---- input projection ----
        h = jnp.dot(x, in_w_ref[...],
                    preferred_element_type=jnp.float32) + in_b_ref[...]
        H = num_heads * head_dim

        # ---- transformer layers (static unrolled loop) ----
        for li in range(num_layers):
            # fused QKV projection: one [S,H] x [H,3H] matmul
            qkv = jnp.dot(h, qkv_w_ref[li],
                          preferred_element_type=jnp.float32) + qkv_b_ref[li]
            q = qkv[:, 0 * H:1 * H] * scale   # fold 1/sqrt(Dh) into q
            k = qkv[:, 1 * H:2 * H]
            v = qkv[:, 2 * H:3 * H]

            # per-head attention, entirely in registers (no HBM traffic)
            head_outs = []
            for hh in range(num_heads):
                lo = hh * head_dim
                hi = lo + head_dim
                qh = q[:, lo:hi]              # [S, Dh]
                kh = k[:, lo:hi]
                vh = v[:, lo:hi]
                s = jnp.dot(qh, kh.T,
                            preferred_element_type=jnp.float32) + bias
                s = s - jnp.max(s, axis=-1, keepdims=True)
                p = jnp.exp(s)
                p = p * pl.reciprocal(jnp.sum(p, axis=-1, keepdims=True),
                                      approx=True)
                # TODO(synk): attention dropout is inference-mode identity.
                head_outs.append(
                    jnp.dot(p, vh, preferred_element_type=jnp.float32))
            attn = jnp.concatenate(head_outs, axis=-1)    # [S, H]

            # output projection + residual + LayerNorm (fused)
            attn = jnp.dot(attn, o_w_ref[li],
                           preferred_element_type=jnp.float32) + o_b_ref[li]
            h = layernorm(h + attn, ln1_g_ref[li], ln1_b_ref[li])

            # feed-forward (FF1 + ReLU + FF2) + residual + LayerNorm (fused)
            ff = jnp.dot(h, ff1_w_ref[li],
                         preferred_element_type=jnp.float32) + ff1_b_ref[li]
            ff = jnp.maximum(ff, 0.0)
            ff = jnp.dot(ff, ff2_w_ref[li],
                         preferred_element_type=jnp.float32) + ff2_b_ref[li]
            h = layernorm(h + ff, ln2_g_ref[li], ln2_b_ref[li])

        # ---- output projection ----
        out = jnp.dot(h, out_w_ref[...],
                      preferred_element_type=jnp.float32) + out_b_ref[...]
        o_ref[...] = out.astype(o_ref.dtype)

    return kernel


# ---------------------------------------------------------------------------
# Wrapper: one pallas_call for the whole forward, grid over batch
# ---------------------------------------------------------------------------

def attention_sampler_forward(params, x, structure_bias, num_heads):
    B, S, F = x.shape
    H = params["in_w"].shape[1]
    L = params["qkv_w"].shape[0]
    Dh = H // num_heads

    kernel = _make_forward_kernel(L, num_heads, Dh)

    def rep(arr):
        # whole-array weight block, identical for every batch step
        # (Pallas skips the re-DMA when the block index does not change).
        n = arr.ndim
        return pl.BlockSpec(arr.shape, lambda b, n=n: (0,) * n)

    in_specs = [
        pl.BlockSpec((None, S, F), lambda b: (b, 0, 0)),   # x
        pl.BlockSpec((None, S, S), lambda b: (b, 0, 0)),   # structure_bias
        rep(params["in_w"]), rep(params["in_b"]),
        rep(params["qkv_w"]), rep(params["qkv_b"]),
        rep(params["o_w"]), rep(params["o_b"]),
        rep(params["ln1_g"]), rep(params["ln1_b"]),
        rep(params["ff1_w"]), rep(params["ff1_b"]),
        rep(params["ff2_w"]), rep(params["ff2_b"]),
        rep(params["ln2_g"]), rep(params["ln2_b"]),
        rep(params["out_w"]), rep(params["out_b"]),
    ]

    return pl.pallas_call(
        kernel,
        out_shape=jax.ShapeDtypeStruct((B, S, F), x.dtype),
        grid=(B,),
        in_specs=in_specs,
        out_specs=pl.BlockSpec((None, S, F), lambda b: (b, 0, 0)),
        compiler_params=pltpu.CompilerParams(
            dimension_semantics=("parallel",)),
    )(x, structure_bias,
      params["in_w"], params["in_b"],
      params["qkv_w"], params["qkv_b"],
      params["o_w"], params["o_b"],
      params["ln1_g"], params["ln1_b"],
      params["ff1_w"], params["ff1_b"],
      params["ff2_w"], params["ff2_b"],
      params["ln2_g"], params["ln2_b"],
      params["out_w"], params["out_b"])


# ---------------------------------------------------------------------------
# Parameter construction (deterministic, synthetic; per-layer tensors stacked)
# ---------------------------------------------------------------------------

def init_params(key, feature_dim, hidden_dim, num_layers):
    H = hidden_dim
    std = 0.05
    keys = jax.random.split(key, 4 + 10 * num_layers)

    def w(k, din, dout):
        return jax.random.normal(k, (din, dout), jnp.float32) * std

    def b(k, dout):
        return jax.random.normal(k, (1, dout), jnp.float32) * std

    params = {
        "in_w": w(keys[0], feature_dim, H),
        "in_b": b(keys[1], H),
        "out_w": w(keys[2], H, feature_dim),
        "out_b": b(keys[3], feature_dim),
    }

    stacks = {name: [] for name in
              ("qkv_w", "qkv_b", "o_w", "o_b", "ln1_g", "ln1_b",
               "ff1_w", "ff1_b", "ff2_w", "ff2_b", "ln2_g", "ln2_b")}
    for li in range(num_layers):
        lk = keys[4 + 10 * li: 4 + 10 * (li + 1)]
        stacks["qkv_w"].append(w(lk[0], H, 3 * H))
        stacks["qkv_b"].append(b(lk[1], 3 * H))
        stacks["o_w"].append(w(lk[2], H, H))
        stacks["o_b"].append(b(lk[3], H))
        stacks["ff1_w"].append(w(lk[4], H, 4 * H))
        stacks["ff1_b"].append(b(lk[5], 4 * H))
        stacks["ff2_w"].append(w(lk[6], 4 * H, H))
        stacks["ff2_b"].append(b(lk[7], H))
        stacks["ln1_g"].append(1.0 + 0.05 * jax.random.normal(lk[8], (1, H), jnp.float32))
        stacks["ln1_b"].append(0.05 * jax.random.normal(lk[8], (1, H), jnp.float32) + 0.0)
        stacks["ln2_g"].append(1.0 + 0.05 * jax.random.normal(lk[9], (1, H), jnp.float32))
        stacks["ln2_b"].append(0.05 * jax.random.normal(lk[9], (1, H), jnp.float32) + 0.0)
    for name, lst in stacks.items():
        params[name] = jnp.stack(lst)          # [L, 1, D] / [L, Din, Dout]
    return params


# ---------------------------------------------------------------------------
# Pure-JAX reference (for correctness check)
# ---------------------------------------------------------------------------

def reference_forward(params, x, structure_bias, num_heads):
    B, S, F = x.shape
    H = params["in_w"].shape[1]
    Dh = H // num_heads
    L = params["qkv_w"].shape[0]

    def ln(t, g, b):
        m = jnp.mean(t, axis=-1, keepdims=True)
        v = jnp.mean(jnp.square(t - m), axis=-1, keepdims=True)
        return (t - m) * jax.lax.rsqrt(v + 1e-5) * g + b

    h = x @ params["in_w"] + params["in_b"]
    for li in range(L):
        qkv = h @ params["qkv_w"][li] + params["qkv_b"][li]
        q, k, v = jnp.split(qkv, 3, axis=-1)

        def split_heads(t):
            return t.reshape(B, S, num_heads, Dh).transpose(0, 2, 1, 3)

        qh, kh, vh = map(split_heads, (q, k, v))
        scores = jnp.einsum("bhqd,bhkd->bhqk", qh, kh) / math.sqrt(Dh)
        scores = scores + structure_bias[:, None, :, :]
        p = jax.nn.softmax(scores, axis=-1)
        o = jnp.einsum("bhqk,bhkd->bhqd", p, vh)
        o = o.transpose(0, 2, 1, 3).reshape(B, S, H)
        o = o @ params["o_w"][li] + params["o_b"][li]
        h = ln(h + o, params["ln1_g"][li], params["ln1_b"][li])

        ff = jnp.maximum(h @ params["ff1_w"][li] + params["ff1_b"][li], 0.0)
        ff = ff @ params["ff2_w"][li] + params["ff2_b"][li]
        h = ln(h + ff, params["ln2_g"][li], params["ln2_b"][li])
    return h @ params["out_w"] + params["out_b"]


# ---------------------------------------------------------------------------
# Main
# ---------------------------------------------------------------------------

if __name__ == "__main__":
    # Small shapes consistent with the module's forward signature.
    batch, seq_len = 2, 8
    feature_dim, hidden_dim = 32, 32
    num_heads, num_layers = 4, 2

    root = jax.random.PRNGKey(0)
    k_param, k_x, k_bias = jax.random.split(root, 3)

    params = init_params(k_param, feature_dim, hidden_dim, num_layers)
    x = jax.random.normal(k_x, (batch, seq_len, feature_dim), jnp.float32)
    structure_bias = 0.1 * jax.random.normal(
        k_bias, (batch, seq_len, seq_len), jnp.float32)

    fwd = jax.jit(partial(attention_sampler_forward, num_heads=num_heads))
    out = jax.block_until_ready(fwd(params, x, structure_bias))

    ref = reference_forward(params, x, structure_bias, num_heads)
    assert out.shape == (batch, seq_len, feature_dim)
    assert jnp.allclose(out, ref, atol=3e-3, rtol=3e-3), "mismatch vs reference"

    print("KERNEL_OK")
</pallas_src>

<mosaic_0001>
module attributes {stable_mosaic.version = 11 : i64} {
  func.func @kernel(%arg0: i32, %arg1: memref<1x8x32xf32, #tpu.memory_space<vmem>>, %arg2: memref<1x8x8xf32, #tpu.memory_space<vmem>>, %arg3: memref<32x32xf32, #tpu.memory_space<vmem>>, %arg4: memref<1x32xf32, #tpu.memory_space<vmem>>, %arg5: memref<2x32x96xf32, #tpu.memory_space<vmem>>, %arg6: memref<2x1x96xf32, #tpu.memory_space<vmem>>, %arg7: memref<2x32x32xf32, #tpu.memory_space<vmem>>, %arg8: memref<2x1x32xf32, #tpu.memory_space<vmem>>, %arg9: memref<2x1x32xf32, #tpu.memory_space<vmem>>, %arg10: memref<2x1x32xf32, #tpu.memory_space<vmem>>, %arg11: memref<2x32x128xf32, #tpu.memory_space<vmem>>, %arg12: memref<2x1x128xf32, #tpu.memory_space<vmem>>, %arg13: memref<2x128x32xf32, #tpu.memory_space<vmem>>, %arg14: memref<2x1x32xf32, #tpu.memory_space<vmem>>, %arg15: memref<2x1x32xf32, #tpu.memory_space<vmem>>, %arg16: memref<2x1x32xf32, #tpu.memory_space<vmem>>, %arg17: memref<32x32xf32, #tpu.memory_space<vmem>>, %arg18: memref<1x32xf32, #tpu.memory_space<vmem>>, %arg19: memref<1x8x32xf32, #tpu.memory_space<vmem>>) attributes {dimension_semantics = [#tpu.dimension_semantics<parallel>], iteration_bounds = array<i64: 2>, scalar_prefetch = 0 : i64, scratch_operands = 0 : i64, tpu.core_type = #tpu.core_type<tc>, window_params = [{transform_indices = @transform_0, window_bounds = array<i64: 1, 8, 32>}, {transform_indices = @transform_1, window_bounds = array<i64: 1, 8, 8>}, {pipeline_mode = #tpu.pipeline_mode<synchronous>, transform_indices = @transform_2, window_bounds = array<i64: 32, 32>}, {pipeline_mode = #tpu.pipeline_mode<synchronous>, transform_indices = @transform_3, window_bounds = array<i64: 1, 32>}, {pipeline_mode = #tpu.pipeline_mode<synchronous>, transform_indices = @transform_4, window_bounds = array<i64: 2, 32, 96>}, {pipeline_mode = #tpu.pipeline_mode<synchronous>, transform_indices = @transform_5, window_bounds = array<i64: 2, 1, 96>}, {pipeline_mode = #tpu.pipeline_mode<synchronous>, transform_indices = @transform_6, window_bounds = array<i64: 2, 32, 32>}, {pipeline_mode = #tpu.pipeline_mode<synchronous>, transform_indices = @transform_7, window_bounds = array<i64: 2, 1, 32>}, {pipeline_mode = #tpu.pipeline_mode<synchronous>, transform_indices = @transform_8, window_bounds = array<i64: 2, 1, 32>}, {pipeline_mode = #tpu.pipeline_mode<synchronous>, transform_indices = @transform_9, window_bounds = array<i64: 2, 1, 32>}, {pipeline_mode = #tpu.pipeline_mode<synchronous>, transform_indices = @transform_10, window_bounds = array<i64: 2, 32, 128>}, {pipeline_mode = #tpu.pipeline_mode<synchronous>, transform_indices = @transform_11, window_bounds = array<i64: 2, 1, 128>}, {pipeline_mode = #tpu.pipeline_mode<synchronous>, transform_indices = @transform_12, window_bounds = array<i64: 2, 128, 32>}, {pipeline_mode = #tpu.pipeline_mode<synchronous>, transform_indices = @transform_13, window_bounds = array<i64: 2, 1, 32>}, {pipeline_mode = #tpu.pipeline_mode<synchronous>, transform_indices = @transform_14, window_bounds = array<i64: 2, 1, 32>}, {pipeline_mode = #tpu.pipeline_mode<synchronous>, transform_indices = @transform_15, window_bounds = array<i64: 2, 1, 32>}, {pipeline_mode = #tpu.pipeline_mode<synchronous>, transform_indices = @transform_16, window_bounds = array<i64: 32, 32>}, {pipeline_mode = #tpu.pipeline_mode<synchronous>, transform_indices = @transform_17, window_bounds = array<i64: 1, 32>}, {transform_indices = @transform_18, window_bounds = array<i64: 1, 8, 32>}]} {
    %c0 = arith.constant 0 : index
    %c0_0 = arith.constant 0 : index
    %c0_1 = arith.constant 0 : index
    %0 = vector.load %arg1[%c0, %c0_0, %c0_1] : memref<1x8x32xf32, #tpu.memory_space<vmem>>, vector<1x8x32xf32>
    %1 = vector.shape_cast %0 : vector<1x8x32xf32> to vector<8x32xf32>
    %c0_2 = arith.constant 0 : index
    %c0_3 = arith.constant 0 : index
    %c0_4 = arith.constant 0 : index
    %2 = vector.load %arg2[%c0_2, %c0_3, %c0_4] : memref<1x8x8xf32, #tpu.memory_space<vmem>>, vector<1x8x8xf32>
    %3 = vector.shape_cast %2 : vector<1x8x8xf32> to vector<8x8xf32>
    %c0_5 = arith.constant 0 : index
    %c0_6 = arith.constant 0 : index
    %4 = vector.load %arg3[%c0_5, %c0_6] : memref<32x32xf32, #tpu.memory_space<vmem>>, vector<32x32xf32>
    %cst = arith.constant dense<0.000000e+00> : vector<8x32xf32>
    %5 = tpu.matmul %1, %4, %cst {dimension_numbers = #tpu.dot_dimension_numbers<[1], [0], [0], [1], [0, 0, 1, 1], [], []>} : vector<8x32xf32>, vector<32x32xf32>, vector<8x32xf32> -> vector<8x32xf32>
    %c0_7 = arith.constant 0 : index
    %c0_8 = arith.constant 0 : index
    %6 = vector.load %arg4[%c0_7, %c0_8] : memref<1x32xf32, #tpu.memory_space<vmem>>, vector<1x32xf32>
    %7 = vector.broadcast %6 : vector<1x32xf32> to vector<8x32xf32>
    %8 = arith.addf %5, %7 : vector<8x32xf32>
    %c0_9 = arith.constant 0 : index
    %c0_10 = arith.constant 0 : index
    %c0_11 = arith.constant 0 : index
    %9 = vector.load %arg5[%c0_9, %c0_10, %c0_11] : memref<2x32x96xf32, #tpu.memory_space<vmem>>, vector<1x32x96xf32>
    %10 = vector.shape_cast %9 : vector<1x32x96xf32> to vector<32x96xf32>
    %cst_12 = arith.constant dense<0.000000e+00> : vector<8x96xf32>
    %11 = tpu.matmul %8, %10, %cst_12 {dimension_numbers = #tpu.dot_dimension_numbers<[1], [0], [0], [1], [0, 0, 1, 1], [], []>} : vector<8x32xf32>, vector<32x96xf32>, vector<8x96xf32> -> vector<8x96xf32>
    %c0_13 = arith.constant 0 : index
    %c0_14 = arith.constant 0 : index
    %c0_15 = arith.constant 0 : index
    %12 = vector.load %arg6[%c0_13, %c0_14, %c0_15] : memref<2x1x96xf32, #tpu.memory_space<vmem>>, vector<1x1x96xf32>
    %13 = vector.shape_cast %12 : vector<1x1x96xf32> to vector<1x96xf32>
    %14 = vector.broadcast %13 : vector<1x96xf32> to vector<8x96xf32>
    %15 = arith.addf %11, %14 : vector<8x96xf32>
    %16 = vector.extract_strided_slice %15 {offsets = [0, 0], sizes = [8, 32], strides = [1, 1]} : vector<8x96xf32> to vector<8x32xf32>
    %cst_16 = arith.constant 0.353553385 : f32
    %17 = vector.broadcast %cst_16 : f32 to vector<8x32xf32>
    %18 = arith.mulf %16, %17 : vector<8x32xf32>
    %19 = vector.extract_strided_slice %15 {offsets = [0, 32], sizes = [8, 32], strides = [1, 1]} : vector<8x96xf32> to vector<8x32xf32>
    %20 = vector.extract_strided_slice %15 {offsets = [0, 64], sizes = [8, 32], strides = [1, 1]} : vector<8x96xf32> to vector<8x32xf32>
    %21 = vector.extract_strided_slice %18 {offsets = [0, 0], sizes = [8, 8], strides = [1, 1]} : vector<8x32xf32> to vector<8x8xf32>
    %22 = vector.extract_strided_slice %19 {offsets = [0, 0], sizes = [8, 8], strides = [1, 1]} : vector<8x32xf32> to vector<8x8xf32>
    %23 = vector.extract_strided_slice %20 {offsets = [0, 0], sizes = [8, 8], strides = [1, 1]} : vector<8x32xf32> to vector<8x8xf32>
    %24 = tpu.transpose %22, [1, 0] : vector<8x8xf32> -> vector<8x8xf32>
    %cst_17 = arith.constant dense<0.000000e+00> : vector<8x8xf32>
    %25 = tpu.matmul %21, %24, %cst_17 {dimension_numbers = #tpu.dot_dimension_numbers<[1], [0], [0], [1], [0, 0, 1, 1], [], []>} : vector<8x8xf32>, vector<8x8xf32>, vector<8x8xf32> -> vector<8x8xf32>
    %26 = arith.addf %25, %3 : vector<8x8xf32>
    %cst_18 = arith.constant dense<0xFF800000> : vector<8xf32>
    %27 = vector.multi_reduction <maximumf>, %26, %cst_18 [1] : vector<8x8xf32> to vector<8xf32>
    %28 = vector.shape_cast %27 : vector<8xf32> to vector<8x1xf32>
    %29 = vector.broadcast %28 : vector<8x1xf32> to vector<8x8xf32>
    %30 = arith.subf %26, %29 : vector<8x8xf32>
    %31 = math.exp %30 : vector<8x8xf32>
    %cst_19 = arith.constant dense<0.000000e+00> : vector<8xf32>
    %32 = vector.multi_reduction <add>, %31, %cst_19 [1] : vector<8x8xf32> to vector<8xf32>
    %33 = vector.shape_cast %32 : vector<8xf32> to vector<8x1xf32>
    %34 = tpu.reciprocal %33 {approx = true} : vector<8x1xf32> -> vector<8x1xf32>
    %35 = vector.broadcast %34 : vector<8x1xf32> to vector<8x8xf32>
    %36 = arith.mulf %31, %35 : vector<8x8xf32>
    %cst_20 = arith.constant dense<0.000000e+00> : vector<8x8xf32>
    %37 = tpu.matmul %36, %23, %cst_20 {dimension_numbers = #tpu.dot_dimension_numbers<[1], [0], [0], [1], [0, 0, 1, 1], [], []>} : vector<8x8xf32>, vector<8x8xf32>, vector<8x8xf32> -> vector<8x8xf32>
    %38 = vector.extract_strided_slice %18 {offsets = [0, 8], sizes = [8, 8], strides = [1, 1]} : vector<8x32xf32> to vector<8x8xf32>
    %39 = vector.extract_strided_slice %19 {offsets = [0, 8], sizes = [8, 8], strides = [1, 1]} : vector<8x32xf32> to vector<8x8xf32>
    %40 = vector.extract_strided_slice %20 {offsets = [0, 8], sizes = [8, 8], strides = [1, 1]} : vector<8x32xf32> to vector<8x8xf32>
    %41 = tpu.transpose %39, [1, 0] : vector<8x8xf32> -> vector<8x8xf32>
    %cst_21 = arith.constant dense<0.000000e+00> : vector<8x8xf32>
    %42 = tpu.matmul %38, %41, %cst_21 {dimension_numbers = #tpu.dot_dimension_numbers<[1], [0], [0], [1], [0, 0, 1, 1], [], []>} : vector<8x8xf32>, vector<8x8xf32>, vector<8x8xf32> -> vector<8x8xf32>
    %43 = arith.addf %42, %3 : vector<8x8xf32>
    %cst_22 = arith.constant dense<0xFF800000> : vector<8xf32>
    %44 = vector.multi_reduction <maximumf>, %43, %cst_22 [1] : vector<8x8xf32> to vector<8xf32>
    %45 = vector.shape_cast %44 : vector<8xf32> to vector<8x1xf32>
    %46 = vector.broadcast %45 : vector<8x1xf32> to vector<8x8xf32>
    %47 = arith.subf %43, %46 : vector<8x8xf32>
    %48 = math.exp %47 : vector<8x8xf32>
    %cst_23 = arith.constant dense<0.000000e+00> : vector<8xf32>
    %49 = vector.multi_reduction <add>, %48, %cst_23 [1] : vector<8x8xf32> to vector<8xf32>
    %50 = vector.shape_cast %49 : vector<8xf32> to vector<8x1xf32>
    %51 = tpu.reciprocal %50 {approx = true} : vector<8x1xf32> -> vector<8x1xf32>
    %52 = vector.broadcast %51 : vector<8x1xf32> to vector<8x8xf32>
    %53 = arith.mulf %48, %52 : vector<8x8xf32>
    %cst_24 = arith.constant dense<0.000000e+00> : vector<8x8xf32>
    %54 = tpu.matmul %53, %40, %cst_24 {dimension_numbers = #tpu.dot_dimension_numbers<[1], [0], [0], [1], [0, 0, 1, 1], [], []>} : vector<8x8xf32>, vector<8x8xf32>, vector<8x8xf32> -> vector<8x8xf32>
    %55 = vector.extract_strided_slice %18 {offsets = [0, 16], sizes = [8, 8], strides = [1, 1]} : vector<8x32xf32> to vector<8x8xf32>
    %56 = vector.extract_strided_slice %19 {offsets = [0, 16], sizes = [8, 8], strides = [1, 1]} : vector<8x32xf32> to vector<8x8xf32>
    %57 = vector.extract_strided_slice %20 {offsets = [0, 16], sizes = [8, 8], strides = [1, 1]} : vector<8x32xf32> to vector<8x8xf32>
    %58 = tpu.transpose %56, [1, 0] : vector<8x8xf32> -> vector<8x8xf32>
    %cst_25 = arith.constant dense<0.000000e+00> : vector<8x8xf32>
    %59 = tpu.matmul %55, %58, %cst_25 {dimension_numbers = #tpu.dot_dimension_numbers<[1], [0], [0], [1], [0, 0, 1, 1], [], []>} : vector<8x8xf32>, vector<8x8xf32>, vector<8x8xf32> -> vector<8x8xf32>
    %60 = arith.addf %59, %3 : vector<8x8xf32>
    %cst_26 = arith.constant dense<0xFF800000> : vector<8xf32>
    %61 = vector.multi_reduction <maximumf>, %60, %cst_26 [1] : vector<8x8xf32> to vector<8xf32>
    %62 = vector.shape_cast %61 : vector<8xf32> to vector<8x1xf32>
    %63 = vector.broadcast %62 : vector<8x1xf32> to vector<8x8xf32>
    %64 = arith.subf %60, %63 : vector<8x8xf32>
    %65 = math.exp %64 : vector<8x8xf32>
    %cst_27 = arith.constant dense<0.000000e+00> : vector<8xf32>
    %66 = vector.multi_reduction <add>, %65, %cst_27 [1] : vector<8x8xf32> to vector<8xf32>
    %67 = vector.shape_cast %66 : vector<8xf32> to vector<8x1xf32>
    %68 = tpu.reciprocal %67 {approx = true} : vector<8x1xf32> -> vector<8x1xf32>
    %69 = vector.broadcast %68 : vector<8x1xf32> to vector<8x8xf32>
    %70 = arith.mulf %65, %69 : vector<8x8xf32>
    %cst_28 = arith.constant dense<0.000000e+00> : vector<8x8xf32>
    %71 = tpu.matmul %70, %57, %cst_28 {dimension_numbers = #tpu.dot_dimension_numbers<[1], [0], [0], [1], [0, 0, 1, 1], [], []>} : vector<8x8xf32>, vector<8x8xf32>, vector<8x8xf32> -> vector<8x8xf32>
    %72 = vector.extract_strided_slice %18 {offsets = [0, 24], sizes = [8, 8], strides = [1, 1]} : vector<8x32xf32> to vector<8x8xf32>
    %73 = vector.extract_strided_slice %19 {offsets = [0, 24], sizes = [8, 8], strides = [1, 1]} : vector<8x32xf32> to vector<8x8xf32>
    %74 = vector.extract_strided_slice %20 {offsets = [0, 24], sizes = [8, 8], strides = [1, 1]} : vector<8x32xf32> to vector<8x8xf32>
    %75 = tpu.transpose %73, [1, 0] : vector<8x8xf32> -> vector<8x8xf32>
    %cst_29 = arith.constant dense<0.000000e+00> : vector<8x8xf32>
    %76 = tpu.matmul %72, %75, %cst_29 {dimension_numbers = #tpu.dot_dimension_numbers<[1], [0], [0], [1], [0, 0, 1, 1], [], []>} : vector<8x8xf32>, vector<8x8xf32>, vector<8x8xf32> -> vector<8x8xf32>
    %77 = arith.addf %76, %3 : vector<8x8xf32>
    %cst_30 = arith.constant dense<0xFF800000> : vector<8xf32>
    %78 = vector.multi_reduction <maximumf>, %77, %cst_30 [1] : vector<8x8xf32> to vector<8xf32>
    %79 = vector.shape_cast %78 : vector<8xf32> to vector<8x1xf32>
    %80 = vector.broadcast %79 : vector<8x1xf32> to vector<8x8xf32>
    %81 = arith.subf %77, %80 : vector<8x8xf32>
    %82 = math.exp %81 : vector<8x8xf32>
    %cst_31 = arith.constant dense<0.000000e+00> : vector<8xf32>
    %83 = vector.multi_reduction <add>, %82, %cst_31 [1] : vector<8x8xf32> to vector<8xf32>
    %84 = vector.shape_cast %83 : vector<8xf32> to vector<8x1xf32>
    %85 = tpu.reciprocal %84 {approx = true} : vector<8x1xf32> -> vector<8x1xf32>
    %86 = vector.broadcast %85 : vector<8x1xf32> to vector<8x8xf32>
    %87 = arith.mulf %82, %86 : vector<8x8xf32>
    %cst_32 = arith.constant dense<0.000000e+00> : vector<8x8xf32>
    %88 = tpu.matmul %87, %74, %cst_32 {dimension_numbers = #tpu.dot_dimension_numbers<[1], [0], [0], [1], [0, 0, 1, 1], [], []>} : vector<8x8xf32>, vector<8x8xf32>, vector<8x8xf32> -> vector<8x8xf32>
    %89 = tpu.concatenate %37, %54, %71, %88 in 1 : vector<8x8xf32>, vector<8x8xf32>, vector<8x8xf32>, vector<8x8xf32> -> vector<8x32xf32>
    %c0_33 = arith.constant 0 : index
    %c0_34 = arith.constant 0 : index
    %c0_35 = arith.constant 0 : index
    %90 = vector.load %arg7[%c0_33, %c0_34, %c0_35] : memref<2x32x32xf32, #tpu.memory_space<vmem>>, vector<1x32x32xf32>
    %91 = vector.shape_cast %90 : vector<1x32x32xf32> to vector<32x32xf32>
    %cst_36 = arith.constant dense<0.000000e+00> : vector<8x32xf32>
    %92 = tpu.matmul %89, %91, %cst_36 {dimension_numbers = #tpu.dot_dimension_numbers<[1], [0], [0], [1], [0, 0, 1, 1], [], []>} : vector<8x32xf32>, vector<32x32xf32>, vector<8x32xf32> -> vector<8x32xf32>
    %c0_37 = arith.constant 0 : index
    %c0_38 = arith.constant 0 : index
    %c0_39 = arith.constant 0 : index
    %93 = vector.load %arg8[%c0_37, %c0_38, %c0_39] : memref<2x1x32xf32, #tpu.memory_space<vmem>>, vector<1x1x32xf32>
    %94 = vector.shape_cast %93 : vector<1x1x32xf32> to vector<1x32xf32>
    %95 = vector.broadcast %94 : vector<1x32xf32> to vector<8x32xf32>
    %96 = arith.addf %92, %95 : vector<8x32xf32>
    %97 = arith.addf %8, %96 : vector<8x32xf32>
    %c0_40 = arith.constant 0 : index
    %c0_41 = arith.constant 0 : index
    %c0_42 = arith.constant 0 : index
    %98 = vector.load %arg9[%c0_40, %c0_41, %c0_42] : memref<2x1x32xf32, #tpu.memory_space<vmem>>, vector<1x1x32xf32>
    %99 = vector.shape_cast %98 : vector<1x1x32xf32> to vector<1x32xf32>
    %c0_43 = arith.constant 0 : index
    %c0_44 = arith.constant 0 : index
    %c0_45 = arith.constant 0 : index
    %100 = vector.load %arg10[%c0_43, %c0_44, %c0_45] : memref<2x1x32xf32, #tpu.memory_space<vmem>>, vector<1x1x32xf32>
    %101 = vector.shape_cast %100 : vector<1x1x32xf32> to vector<1x32xf32>
    %cst_46 = arith.constant dense<0.000000e+00> : vector<8xf32>
    %102 = vector.multi_reduction <add>, %97, %cst_46 [1] : vector<8x32xf32> to vector<8xf32>
    %103 = vector.shape_cast %102 : vector<8xf32> to vector<8x1xf32>
    %cst_47 = arith.constant 3.200000e+01 : f32
    %104 = vector.broadcast %cst_47 : f32 to vector<8x1xf32>
    %105 = arith.divf %103, %104 : vector<8x1xf32>
    %106 = vector.broadcast %105 : vector<8x1xf32> to vector<8x32xf32>
    %107 = arith.subf %97, %106 : vector<8x32xf32>
    %108 = arith.mulf %107, %107 : vector<8x32xf32>
    %cst_48 = arith.constant dense<0.000000e+00> : vector<8xf32>
    %109 = vector.multi_reduction <add>, %108, %cst_48 [1] : vector<8x32xf32> to vector<8xf32>
    %110 = vector.shape_cast %109 : vector<8xf32> to vector<8x1xf32>
    %cst_49 = arith.constant 3.200000e+01 : f32
    %111 = vector.broadcast %cst_49 : f32 to vector<8x1xf32>
    %112 = arith.divf %110, %111 : vector<8x1xf32>
    %113 = vector.broadcast %105 : vector<8x1xf32> to vector<8x32xf32>
    %114 = arith.subf %97, %113 : vector<8x32xf32>
    %cst_50 = arith.constant 9.99999974E-6 : f32
    %115 = vector.broadcast %cst_50 : f32 to vector<8x1xf32>
    %116 = arith.addf %112, %115 : vector<8x1xf32>
    %117 = math.rsqrt %116 : vector<8x1xf32>
    %118 = vector.broadcast %117 : vector<8x1xf32> to vector<8x32xf32>
    %119 = arith.mulf %114, %118 : vector<8x32xf32>
    %120 = vector.broadcast %99 : vector<1x32xf32> to vector<8x32xf32>
    %121 = arith.mulf %119, %120 : vector<8x32xf32>
    %122 = vector.broadcast %101 : vector<1x32xf32> to vector<8x32xf32>
    %123 = arith.addf %121, %122 : vector<8x32xf32>
    %c0_51 = arith.constant 0 : index
    %c0_52 = arith.constant 0 : index
    %c0_53 = arith.constant 0 : index
    %124 = vector.load %arg11[%c0_51, %c0_52, %c0_53] : memref<2x32x128xf32, #tpu.memory_space<vmem>>, vector<1x32x128xf32>
    %125 = vector.shape_cast %124 : vector<1x32x128xf32> to vector<32x128xf32>
    %cst_54 = arith.constant dense<0.000000e+00> : vector<8x128xf32>
    %126 = tpu.matmul %123, %125, %cst_54 {dimension_numbers = #tpu.dot_dimension_numbers<[1], [0], [0], [1], [0, 0, 1, 1], [], []>} : vector<8x32xf32>, vector<32x128xf32>, vector<8x128xf32> -> vector<8x128xf32>
    %c0_55 = arith.constant 0 : index
    %c0_56 = arith.constant 0 : index
    %c0_57 = arith.constant 0 : index
    %127 = vector.load %arg12[%c0_55, %c0_56, %c0_57] : memref<2x1x128xf32, #tpu.memory_space<vmem>>, vector<1x1x128xf32>
    %128 = vector.shape_cast %127 : vector<1x1x128xf32> to vector<1x128xf32>
    %129 = vector.broadcast %128 : vector<1x128xf32> to vector<8x128xf32>
    %130 = arith.addf %126, %129 : vector<8x128xf32>
    %cst_58 = arith.constant 0.000000e+00 : f32
    %131 = vector.broadcast %cst_58 : f32 to vector<8x128xf32>
    %132 = arith.maximumf %130, %131 : vector<8x128xf32>
    %c0_59 = arith.constant 0 : index
    %c0_60 = arith.constant 0 : index
    %c0_61 = arith.constant 0 : index
    %133 = vector.load %arg13[%c0_59, %c0_60, %c0_61] : memref<2x128x32xf32, #tpu.memory_space<vmem>>, vector<1x128x32xf32>
    %134 = vector.shape_cast %133 : vector<1x128x32xf32> to vector<128x32xf32>
    %cst_62 = arith.constant dense<0.000000e+00> : vector<8x32xf32>
    %135 = tpu.matmul %132, %134, %cst_62 {dimension_numbers = #tpu.dot_dimension_numbers<[1], [0], [0], [1], [0, 0, 1, 1], [], []>} : vector<8x128xf32>, vector<128x32xf32>, vector<8x32xf32> -> vector<8x32xf32>
    %c0_63 = arith.constant 0 : index
    %c0_64 = arith.constant 0 : index
    %c0_65 = arith.constant 0 : index
    %136 = vector.load %arg14[%c0_63, %c0_64, %c0_65] : memref<2x1x32xf32, #tpu.memory_space<vmem>>, vector<1x1x32xf32>
    %137 = vector.shape_cast %136 : vector<1x1x32xf32> to vector<1x32xf32>
    %138 = vector.broadcast %137 : vector<1x32xf32> to vector<8x32xf32>
    %139 = arith.addf %135, %138 : vector<8x32xf32>
    %140 = arith.addf %123, %139 : vector<8x32xf32>
    %c0_66 = arith.constant 0 : index
    %c0_67 = arith.constant 0 : index
    %c0_68 = arith.constant 0 : index
    %141 = vector.load %arg15[%c0_66, %c0_67, %c0_68] : memref<2x1x32xf32, #tpu.memory_space<vmem>>, vector<1x1x32xf32>
    %142 = vector.shape_cast %141 : vector<1x1x32xf32> to vector<1x32xf32>
    %c0_69 = arith.constant 0 : index
    %c0_70 = arith.constant 0 : index
    %c0_71 = arith.constant 0 : index
    %143 = vector.load %arg16[%c0_69, %c0_70, %c0_71] : memref<2x1x32xf32, #tpu.memory_space<vmem>>, vector<1x1x32xf32>
    %144 = vector.shape_cast %143 : vector<1x1x32xf32> to vector<1x32xf32>
    %cst_72 = arith.constant dense<0.000000e+00> : vector<8xf32>
    %145 = vector.multi_reduction <add>, %140, %cst_72 [1] : vector<8x32xf32> to vector<8xf32>
    %146 = vector.shape_cast %145 : vector<8xf32> to vector<8x1xf32>
    %cst_73 = arith.constant 3.200000e+01 : f32
    %147 = vector.broadcast %cst_73 : f32 to vector<8x1xf32>
    %148 = arith.divf %146, %147 : vector<8x1xf32>
    %149 = vector.broadcast %148 : vector<8x1xf32> to vector<8x32xf32>
    %150 = arith.subf %140, %149 : vector<8x32xf32>
    %151 = arith.mulf %150, %150 : vector<8x32xf32>
    %cst_74 = arith.constant dense<0.000000e+00> : vector<8xf32>
    %152 = vector.multi_reduction <add>, %151, %cst_74 [1] : vector<8x32xf32> to vector<8xf32>
    %153 = vector.shape_cast %152 : vector<8xf32> to vector<8x1xf32>
    %cst_75 = arith.constant 3.200000e+01 : f32
    %154 = vector.broadcast %cst_75 : f32 to vector<8x1xf32>
    %155 = arith.divf %153, %154 : vector<8x1xf32>
    %156 = vector.broadcast %148 : vector<8x1xf32> to vector<8x32xf32>
    %157 = arith.subf %140, %156 : vector<8x32xf32>
    %cst_76 = arith.constant 9.99999974E-6 : f32
    %158 = vector.broadcast %cst_76 : f32 to vector<8x1xf32>
    %159 = arith.addf %155, %158 : vector<8x1xf32>
    %160 = math.rsqrt %159 : vector<8x1xf32>
    %161 = vector.broadcast %160 : vector<8x1xf32> to vector<8x32xf32>
    %162 = arith.mulf %157, %161 : vector<8x32xf32>
    %163 = vector.broadcast %142 : vector<1x32xf32> to vector<8x32xf32>
    %164 = arith.mulf %162, %163 : vector<8x32xf32>
    %165 = vector.broadcast %144 : vector<1x32xf32> to vector<8x32xf32>
    %166 = arith.addf %164, %165 : vector<8x32xf32>
    %c1 = arith.constant 1 : index
    %c0_77 = arith.constant 0 : index
    %c0_78 = arith.constant 0 : index
    %167 = vector.load %arg5[%c1, %c0_77, %c0_78] : memref<2x32x96xf32, #tpu.memory_space<vmem>>, vector<1x32x96xf32>
    %168 = vector.shape_cast %167 : vector<1x32x96xf32> to vector<32x96xf32>
    %cst_79 = arith.constant dense<0.000000e+00> : vector<8x96xf32>
    %169 = tpu.matmul %166, %168, %cst_79 {dimension_numbers = #tpu.dot_dimension_numbers<[1], [0], [0], [1], [0, 0, 1, 1], [], []>} : vector<8x32xf32>, vector<32x96xf32>, vector<8x96xf32> -> vector<8x96xf32>
    %c1_80 = arith.constant 1 : index
    %c0_81 = arith.constant 0 : index
    %c0_82 = arith.constant 0 : index
    %170 = vector.load %arg6[%c1_80, %c0_81, %c0_82] : memref<2x1x96xf32, #tpu.memory_space<vmem>>, vector<1x1x96xf32>
    %171 = vector.shape_cast %170 : vector<1x1x96xf32> to vector<1x96xf32>
    %172 = vector.broadcast %171 : vector<1x96xf32> to vector<8x96xf32>
    %173 = arith.addf %169, %172 : vector<8x96xf32>
    %174 = vector.extract_strided_slice %173 {offsets = [0, 0], sizes = [8, 32], strides = [1, 1]} : vector<8x96xf32> to vector<8x32xf32>
    %cst_83 = arith.constant 0.353553385 : f32
    %175 = vector.broadcast %cst_83 : f32 to vector<8x32xf32>
    %176 = arith.mulf %174, %175 : vector<8x32xf32>
    %177 = vector.extract_strided_slice %173 {offsets = [0, 32], sizes = [8, 32], strides = [1, 1]} : vector<8x96xf32> to vector<8x32xf32>
    %178 = vector.extract_strided_slice %173 {offsets = [0, 64], sizes = [8, 32], strides = [1, 1]} : vector<8x96xf32> to vector<8x32xf32>
    %179 = vector.extract_strided_slice %176 {offsets = [0, 0], sizes = [8, 8], strides = [1, 1]} : vector<8x32xf32> to vector<8x8xf32>
    %180 = vector.extract_strided_slice %177 {offsets = [0, 0], sizes = [8, 8], strides = [1, 1]} : vector<8x32xf32> to vector<8x8xf32>
    %181 = vector.extract_strided_slice %178 {offsets = [0, 0], sizes = [8, 8], strides = [1, 1]} : vector<8x32xf32> to vector<8x8xf32>
    %182 = tpu.transpose %180, [1, 0] : vector<8x8xf32> -> vector<8x8xf32>
    %cst_84 = arith.constant dense<0.000000e+00> : vector<8x8xf32>
    %183 = tpu.matmul %179, %182, %cst_84 {dimension_numbers = #tpu.dot_dimension_numbers<[1], [0], [0], [1], [0, 0, 1, 1], [], []>} : vector<8x8xf32>, vector<8x8xf32>, vector<8x8xf32> -> vector<8x8xf32>
    %184 = arith.addf %183, %3 : vector<8x8xf32>
    %cst_85 = arith.constant dense<0xFF800000> : vector<8xf32>
    %185 = vector.multi_reduction <maximumf>, %184, %cst_85 [1] : vector<8x8xf32> to vector<8xf32>
    %186 = vector.shape_cast %185 : vector<8xf32> to vector<8x1xf32>
    %187 = vector.broadcast %186 : vector<8x1xf32> to vector<8x8xf32>
    %188 = arith.subf %184, %187 : vector<8x8xf32>
    %189 = math.exp %188 : vector<8x8xf32>
    %cst_86 = arith.constant dense<0.000000e+00> : vector<8xf32>
    %190 = vector.multi_reduction <add>, %189, %cst_86 [1] : vector<8x8xf32> to vector<8xf32>
    %191 = vector.shape_cast %190 : vector<8xf32> to vector<8x1xf32>
    %192 = tpu.reciprocal %191 {approx = true} : vector<8x1xf32> -> vector<8x1xf32>
    %193 = vector.broadcast %192 : vector<8x1xf32> to vector<8x8xf32>
    %194 = arith.mulf %189, %193 : vector<8x8xf32>
    %cst_87 = arith.constant dense<0.000000e+00> : vector<8x8xf32>
    %195 = tpu.matmul %194, %181, %cst_87 {dimension_numbers = #tpu.dot_dimension_numbers<[1], [0], [0], [1], [0, 0, 1, 1], [], []>} : vector<8x8xf32>, vector<8x8xf32>, vector<8x8xf32> -> vector<8x8xf32>
    %196 = vector.extract_strided_slice %176 {offsets = [0, 8], sizes = [8, 8], strides = [1, 1]} : vector<8x32xf32> to vector<8x8xf32>
    %197 = vector.extract_strided_slice %177 {offsets = [0, 8], sizes = [8, 8], strides = [1, 1]} : vector<8x32xf32> to vector<8x8xf32>
    %198 = vector.extract_strided_slice %178 {offsets = [0, 8], sizes = [8, 8], strides = [1, 1]} : vector<8x32xf32> to vector<8x8xf32>
    %199 = tpu.transpose %197, [1, 0] : vector<8x8xf32> -> vector<8x8xf32>
    %cst_88 = arith.constant dense<0.000000e+00> : vector<8x8xf32>
    %200 = tpu.matmul %196, %199, %cst_88 {dimension_numbers = #tpu.dot_dimension_numbers<[1], [0], [0], [1], [0, 0, 1, 1], [], []>} : vector<8x8xf32>, vector<8x8xf32>, vector<8x8xf32> -> vector<8x8xf32>
    %201 = arith.addf %200, %3 : vector<8x8xf32>
    %cst_89 = arith.constant dense<0xFF800000> : vector<8xf32>
    %202 = vector.multi_reduction <maximumf>, %201, %cst_89 [1] : vector<8x8xf32> to vector<8xf32>
    %203 = vector.shape_cast %202 : vector<8xf32> to vector<8x1xf32>
    %204 = vector.broadcast %203 : vector<8x1xf32> to vector<8x8xf32>
    %205 = arith.subf %201, %204 : vector<8x8xf32>
    %206 = math.exp %205 : vector<8x8xf32>
    %cst_90 = arith.constant dense<0.000000e+00> : vector<8xf32>
    %207 = vector.multi_reduction <add>, %206, %cst_90 [1] : vector<8x8xf32> to vector<8xf32>
    %208 = vector.shape_cast %207 : vector<8xf32> to vector<8x1xf32>
    %209 = tpu.reciprocal %208 {approx = true} : vector<8x1xf32> -> vector<8x1xf32>
    %210 = vector.broadcast %209 : vector<8x1xf32> to vector<8x8xf32>
    %211 = arith.mulf %206, %210 : vector<8x8xf32>
    %cst_91 = arith.constant dense<0.000000e+00> : vector<8x8xf32>
    %212 = tpu.matmul %211, %198, %cst_91 {dimension_numbers = #tpu.dot_dimension_numbers<[1], [0], [0], [1], [0, 0, 1, 1], [], []>} : vector<8x8xf32>, vector<8x8xf32>, vector<8x8xf32> -> vector<8x8xf32>
    %213 = vector.extract_strided_slice %176 {offsets = [0, 16], sizes = [8, 8], strides = [1, 1]} : vector<8x32xf32> to vector<8x8xf32>
    %214 = vector.extract_strided_slice %177 {offsets = [0, 16], sizes = [8, 8], strides = [1, 1]} : vector<8x32xf32> to vector<8x8xf32>
    %215 = vector.extract_strided_slice %178 {offsets = [0, 16], sizes = [8, 8], strides = [1, 1]} : vector<8x32xf32> to vector<8x8xf32>
    %216 = tpu.transpose %214, [1, 0] : vector<8x8xf32> -> vector<8x8xf32>
    %cst_92 = arith.constant dense<0.000000e+00> : vector<8x8xf32>
    %217 = tpu.matmul %213, %216, %cst_92 {dimension_numbers = #tpu.dot_dimension_numbers<[1], [0], [0], [1], [0, 0, 1, 1], [], []>} : vector<8x8xf32>, vector<8x8xf32>, vector<8x8xf32> -> vector<8x8xf32>
    %218 = arith.addf %217, %3 : vector<8x8xf32>
    %cst_93 = arith.constant dense<0xFF800000> : vector<8xf32>
    %219 = vector.multi_reduction <maximumf>, %218, %cst_93 [1] : vector<8x8xf32> to vector<8xf32>
    %220 = vector.shape_cast %219 : vector<8xf32> to vector<8x1xf32>
    %221 = vector.broadcast %220 : vector<8x1xf32> to vector<8x8xf32>
    %222 = arith.subf %218, %221 : vector<8x8xf32>
    %223 = math.exp %222 : vector<8x8xf32>
    %cst_94 = arith.constant dense<0.000000e+00> : vector<8xf32>
    %224 = vector.multi_reduction <add>, %223, %cst_94 [1] : vector<8x8xf32> to vector<8xf32>
    %225 = vector.shape_cast %224 : vector<8xf32> to vector<8x1xf32>
    %226 = tpu.reciprocal %225 {approx = true} : vector<8x1xf32> -> vector<8x1xf32>
    %227 = vector.broadcast %226 : vector<8x1xf32> to vector<8x8xf32>
    %228 = arith.mulf %223, %227 : vector<8x8xf32>
    %cst_95 = arith.constant dense<0.000000e+00> : vector<8x8xf32>
    %229 = tpu.matmul %228, %215, %cst_95 {dimension_numbers = #tpu.dot_dimension_numbers<[1], [0], [0], [1], [0, 0, 1, 1], [], []>} : vector<8x8xf32>, vector<8x8xf32>, vector<8x8xf32> -> vector<8x8xf32>
    %230 = vector.extract_strided_slice %176 {offsets = [0, 24], sizes = [8, 8], strides = [1, 1]} : vector<8x32xf32> to vector<8x8xf32>
    %231 = vector.extract_strided_slice %177 {offsets = [0, 24], sizes = [8, 8], strides = [1, 1]} : vector<8x32xf32> to vector<8x8xf32>
    %232 = vector.extract_strided_slice %178 {offsets = [0, 24], sizes = [8, 8], strides = [1, 1]} : vector<8x32xf32> to vector<8x8xf32>
    %233 = tpu.transpose %231, [1, 0] : vector<8x8xf32> -> vector<8x8xf32>
    %cst_96 = arith.constant dense<0.000000e+00> : vector<8x8xf32>
    %234 = tpu.matmul %230, %233, %cst_96 {dimension_numbers = #tpu.dot_dimension_numbers<[1], [0], [0], [1], [0, 0, 1, 1], [], []>} : vector<8x8xf32>, vector<8x8xf32>, vector<8x8xf32> -> vector<8x8xf32>
    %235 = arith.addf %234, %3 : vector<8x8xf32>
    %cst_97 = arith.constant dense<0xFF800000> : vector<8xf32>
    %236 = vector.multi_reduction <maximumf>, %235, %cst_97 [1] : vector<8x8xf32> to vector<8xf32>
    %237 = vector.shape_cast %236 : vector<8xf32> to vector<8x1xf32>
    %238 = vector.broadcast %237 : vector<8x1xf32> to vector<8x8xf32>
    %239 = arith.subf %235, %238 : vector<8x8xf32>
    %240 = math.exp %239 : vector<8x8xf32>
    %cst_98 = arith.constant dense<0.000000e+00> : vector<8xf32>
    %241 = vector.multi_reduction <add>, %240, %cst_98 [1] : vector<8x8xf32> to vector<8xf32>
    %242 = vector.shape_cast %241 : vector<8xf32> to vector<8x1xf32>
    %243 = tpu.reciprocal %242 {approx = true} : vector<8x1xf32> -> vector<8x1xf32>
    %244 = vector.broadcast %243 : vector<8x1xf32> to vector<8x8xf32>
    %245 = arith.mulf %240, %244 : vector<8x8xf32>
    %cst_99 = arith.constant dense<0.000000e+00> : vector<8x8xf32>
    %246 = tpu.matmul %245, %232, %cst_99 {dimension_numbers = #tpu.dot_dimension_numbers<[1], [0], [0], [1], [0, 0, 1, 1], [], []>} : vector<8x8xf32>, vector<8x8xf32>, vector<8x8xf32> -> vector<8x8xf32>
    %247 = tpu.concatenate %195, %212, %229, %246 in 1 : vector<8x8xf32>, vector<8x8xf32>, vector<8x8xf32>, vector<8x8xf32> -> vector<8x32xf32>
    %c1_100 = arith.constant 1 : index
    %c0_101 = arith.constant 0 : index
    %c0_102 = arith.constant 0 : index
    %248 = vector.load %arg7[%c1_100, %c0_101, %c0_102] : memref<2x32x32xf32, #tpu.memory_space<vmem>>, vector<1x32x32xf32>
    %249 = vector.shape_cast %248 : vector<1x32x32xf32> to vector<32x32xf32>
    %cst_103 = arith.constant dense<0.000000e+00> : vector<8x32xf32>
    %250 = tpu.matmul %247, %249, %cst_103 {dimension_numbers = #tpu.dot_dimension_numbers<[1], [0], [0], [1], [0, 0, 1, 1], [], []>} : vector<8x32xf32>, vector<32x32xf32>, vector<8x32xf32> -> vector<8x32xf32>
    %c1_104 = arith.constant 1 : index
    %c0_105 = arith.constant 0 : index
    %c0_106 = arith.constant 0 : index
    %251 = vector.load %arg8[%c1_104, %c0_105, %c0_106] : memref<2x1x32xf32, #tpu.memory_space<vmem>>, vector<1x1x32xf32>
    %252 = vector.shape_cast %251 : vector<1x1x32xf32> to vector<1x32xf32>
    %253 = vector.broadcast %252 : vector<1x32xf32> to vector<8x32xf32>
    %254 = arith.addf %250, %253 : vector<8x32xf32>
    %255 = arith.addf %166, %254 : vector<8x32xf32>
    %c1_107 = arith.constant 1 : index
    %c0_108 = arith.constant 0 : index
    %c0_109 = arith.constant 0 : index
    %256 = vector.load %arg9[%c1_107, %c0_108, %c0_109] : memref<2x1x32xf32, #tpu.memory_space<vmem>>, vector<1x1x32xf32>
    %257 = vector.shape_cast %256 : vector<1x1x32xf32> to vector<1x32xf32>
    %c1_110 = arith.constant 1 : index
    %c0_111 = arith.constant 0 : index
    %c0_112 = arith.constant 0 : index
    %258 = vector.load %arg10[%c1_110, %c0_111, %c0_112] : memref<2x1x32xf32, #tpu.memory_space<vmem>>, vector<1x1x32xf32>
    %259 = vector.shape_cast %258 : vector<1x1x32xf32> to vector<1x32xf32>
    %cst_113 = arith.constant dense<0.000000e+00> : vector<8xf32>
    %260 = vector.multi_reduction <add>, %255, %cst_113 [1] : vector<8x32xf32> to vector<8xf32>
    %261 = vector.shape_cast %260 : vector<8xf32> to vector<8x1xf32>
    %cst_114 = arith.constant 3.200000e+01 : f32
    %262 = vector.broadcast %cst_114 : f32 to vector<8x1xf32>
    %263 = arith.divf %261, %262 : vector<8x1xf32>
    %264 = vector.broadcast %263 : vector<8x1xf32> to vector<8x32xf32>
    %265 = arith.subf %255, %264 : vector<8x32xf32>
    %266 = arith.mulf %265, %265 : vector<8x32xf32>
    %cst_115 = arith.constant dense<0.000000e+00> : vector<8xf32>
    %267 = vector.multi_reduction <add>, %266, %cst_115 [1] : vector<8x32xf32> to vector<8xf32>
    %268 = vector.shape_cast %267 : vector<8xf32> to vector<8x1xf32>
    %cst_116 = arith.constant 3.200000e+01 : f32
    %269 = vector.broadcast %cst_116 : f32 to vector<8x1xf32>
    %270 = arith.divf %268, %269 : vector<8x1xf32>
    %271 = vector.broadcast %263 : vector<8x1xf32> to vector<8x32xf32>
    %272 = arith.subf %255, %271 : vector<8x32xf32>
    %cst_117 = arith.constant 9.99999974E-6 : f32
    %273 = vector.broadcast %cst_117 : f32 to vector<8x1xf32>
    %274 = arith.addf %270, %273 : vector<8x1xf32>
    %275 = math.rsqrt %274 : vector<8x1xf32>
    %276 = vector.broadcast %275 : vector<8x1xf32> to vector<8x32xf32>
    %277 = arith.mulf %272, %276 : vector<8x32xf32>
    %278 = vector.broadcast %257 : vector<1x32xf32> to vector<8x32xf32>
    %279 = arith.mulf %277, %278 : vector<8x32xf32>
    %280 = vector.broadcast %259 : vector<1x32xf32> to vector<8x32xf32>
    %281 = arith.addf %279, %280 : vector<8x32xf32>
    %c1_118 = arith.constant 1 : index
    %c0_119 = arith.constant 0 : index
    %c0_120 = arith.constant 0 : index
    %282 = vector.load %arg11[%c1_118, %c0_119, %c0_120] : memref<2x32x128xf32, #tpu.memory_space<vmem>>, vector<1x32x128xf32>
    %283 = vector.shape_cast %282 : vector<1x32x128xf32> to vector<32x128xf32>
    %cst_121 = arith.constant dense<0.000000e+00> : vector<8x128xf32>
    %284 = tpu.matmul %281, %283, %cst_121 {dimension_numbers = #tpu.dot_dimension_numbers<[1], [0], [0], [1], [0, 0, 1, 1], [], []>} : vector<8x32xf32>, vector<32x128xf32>, vector<8x128xf32> -> vector<8x128xf32>
    %c1_122 = arith.constant 1 : index
    %c0_123 = arith.constant 0 : index
    %c0_124 = arith.constant 0 : index
    %285 = vector.load %arg12[%c1_122, %c0_123, %c0_124] : memref<2x1x128xf32, #tpu.memory_space<vmem>>, vector<1x1x128xf32>
    %286 = vector.shape_cast %285 : vector<1x1x128xf32> to vector<1x128xf32>
    %287 = vector.broadcast %286 : vector<1x128xf32> to vector<8x128xf32>
    %288 = arith.addf %284, %287 : vector<8x128xf32>
    %cst_125 = arith.constant 0.000000e+00 : f32
    %289 = vector.broadcast %cst_125 : f32 to vector<8x128xf32>
    %290 = arith.maximumf %288, %289 : vector<8x128xf32>
    %c1_126 = arith.constant 1 : index
    %c0_127 = arith.constant 0 : index
    %c0_128 = arith.constant 0 : index
    %291 = vector.load %arg13[%c1_126, %c0_127, %c0_128] : memref<2x128x32xf32, #tpu.memory_space<vmem>>, vector<1x128x32xf32>
    %292 = vector.shape_cast %291 : vector<1x128x32xf32> to vector<128x32xf32>
    %cst_129 = arith.constant dense<0.000000e+00> : vector<8x32xf32>
    %293 = tpu.matmul %290, %292, %cst_129 {dimension_numbers = #tpu.dot_dimension_numbers<[1], [0], [0], [1], [0, 0, 1, 1], [], []>} : vector<8x128xf32>, vector<128x32xf32>, vector<8x32xf32> -> vector<8x32xf32>
    %c1_130 = arith.constant 1 : index
    %c0_131 = arith.constant 0 : index
    %c0_132 = arith.constant 0 : index
    %294 = vector.load %arg14[%c1_130, %c0_131, %c0_132] : memref<2x1x32xf32, #tpu.memory_space<vmem>>, vector<1x1x32xf32>
    %295 = vector.shape_cast %294 : vector<1x1x32xf32> to vector<1x32xf32>
    %296 = vector.broadcast %295 : vector<1x32xf32> to vector<8x32xf32>
    %297 = arith.addf %293, %296 : vector<8x32xf32>
    %298 = arith.addf %281, %297 : vector<8x32xf32>
    %c1_133 = arith.constant 1 : index
    %c0_134 = arith.constant 0 : index
    %c0_135 = arith.constant 0 : index
    %299 = vector.load %arg15[%c1_133, %c0_134, %c0_135] : memref<2x1x32xf32, #tpu.memory_space<vmem>>, vector<1x1x32xf32>
    %300 = vector.shape_cast %299 : vector<1x1x32xf32> to vector<1x32xf32>
    %c1_136 = arith.constant 1 : index
    %c0_137 = arith.constant 0 : index
    %c0_138 = arith.constant 0 : index
    %301 = vector.load %arg16[%c1_136, %c0_137, %c0_138] : memref<2x1x32xf32, #tpu.memory_space<vmem>>, vector<1x1x32xf32>
    %302 = vector.shape_cast %301 : vector<1x1x32xf32> to vector<1x32xf32>
    %cst_139 = arith.constant dense<0.000000e+00> : vector<8xf32>
    %303 = vector.multi_reduction <add>, %298, %cst_139 [1] : vector<8x32xf32> to vector<8xf32>
    %304 = vector.shape_cast %303 : vector<8xf32> to vector<8x1xf32>
    %cst_140 = arith.constant 3.200000e+01 : f32
    %305 = vector.broadcast %cst_140 : f32 to vector<8x1xf32>
    %306 = arith.divf %304, %305 : vector<8x1xf32>
    %307 = vector.broadcast %306 : vector<8x1xf32> to vector<8x32xf32>
    %308 = arith.subf %298, %307 : vector<8x32xf32>
    %309 = arith.mulf %308, %308 : vector<8x32xf32>
    %cst_141 = arith.constant dense<0.000000e+00> : vector<8xf32>
    %310 = vector.multi_reduction <add>, %309, %cst_141 [1] : vector<8x32xf32> to vector<8xf32>
    %311 = vector.shape_cast %310 : vector<8xf32> to vector<8x1xf32>
    %cst_142 = arith.constant 3.200000e+01 : f32
    %312 = vector.broadcast %cst_142 : f32 to vector<8x1xf32>
    %313 = arith.divf %311, %312 : vector<8x1xf32>
    %314 = vector.broadcast %306 : vector<8x1xf32> to vector<8x32xf32>
    %315 = arith.subf %298, %314 : vector<8x32xf32>
    %cst_143 = arith.constant 9.99999974E-6 : f32
    %316 = vector.broadcast %cst_143 : f32 to vector<8x1xf32>
    %317 = arith.addf %313, %316 : vector<8x1xf32>
    %318 = math.rsqrt %317 : vector<8x1xf32>
    %319 = vector.broadcast %318 : vector<8x1xf32> to vector<8x32xf32>
    %320 = arith.mulf %315, %319 : vector<8x32xf32>
    %321 = vector.broadcast %300 : vector<1x32xf32> to vector<8x32xf32>
    %322 = arith.mulf %320, %321 : vector<8x32xf32>
    %323 = vector.broadcast %302 : vector<1x32xf32> to vector<8x32xf32>
    %324 = arith.addf %322, %323 : vector<8x32xf32>
    %c0_144 = arith.constant 0 : index
    %c0_145 = arith.constant 0 : index
    %325 = vector.load %arg17[%c0_144, %c0_145] : memref<32x32xf32, #tpu.memory_space<vmem>>, vector<32x32xf32>
    %cst_146 = arith.constant dense<0.000000e+00> : vector<8x32xf32>
    %326 = tpu.matmul %324, %325, %cst_146 {dimension_numbers = #tpu.dot_dimension_numbers<[1], [0], [0], [1], [0, 0, 1, 1], [], []>} : vector<8x32xf32>, vector<32x32xf32>, vector<8x32xf32> -> vector<8x32xf32>
    %c0_147 = arith.constant 0 : index
    %c0_148 = arith.constant 0 : index
    %327 = vector.load %arg18[%c0_147, %c0_148] : memref<1x32xf32, #tpu.memory_space<vmem>>, vector<1x32xf32>
    %328 = vector.broadcast %327 : vector<1x32xf32> to vector<8x32xf32>
    %329 = arith.addf %326, %328 : vector<8x32xf32>
    %c0_149 = arith.constant 0 : index
    %c0_150 = arith.constant 0 : index
    %c0_151 = arith.constant 0 : index
    %330 = vector.load %arg19[%c0_149, %c0_150, %c0_151] : memref<1x8x32xf32, #tpu.memory_space<vmem>>, vector<1x8x32xf32>
    %331 = vector.shape_cast %330 : vector<1x8x32xf32> to vector<8x32xf32>
    %332 = vector.shape_cast %329 : vector<8x32xf32> to vector<1x8x32xf32>
    tpu.vector_store %arg19[%c0_149, %c0_150, %c0_151], %332 {strides = array<i32>} : memref<1x8x32xf32, #tpu.memory_space<vmem>>, vector<1x8x32xf32>,
    return
  }
  func.func @transform_0(%arg0: i32) -> (i32, i32, i32) {
    %c0_i32 = arith.constant 0 : i32
    %c0_i32_0 = arith.constant 0 : i32
    %c0_i32_1 = arith.constant 0 : i32
    return %arg0, %c0_i32, %c0_i32_0 : i32, i32, i32
  }
  func.func @transform_1(%arg0: i32) -> (i32, i32, i32) {
    %c0_i32 = arith.constant 0 : i32
    %c0_i32_0 = arith.constant 0 : i32
    %c0_i32_1 = arith.constant 0 : i32
    return %arg0, %c0_i32, %c0_i32_0 : i32, i32, i32
  }
  func.func @transform_2(%arg0: i32) -> (i32, i32) {
    %c0_i32 = arith.constant 0 : i32
    %c0_i32_0 = arith.constant 0 : i32
    %c0_i32_1 = arith.constant 0 : i32
    return %c0_i32, %c0_i32_0 : i32, i32
  }
  func.func @transform_3(%arg0: i32) -> (i32, i32) {
    %c0_i32 = arith.constant 0 : i32
    %c0_i32_0 = arith.constant 0 : i32
    %c0_i32_1 = arith.constant 0 : i32
    return %c0_i32, %c0_i32_0 : i32, i32
  }
  func.func @transform_4(%arg0: i32) -> (i32, i32, i32) {
    %c0_i32 = arith.constant 0 : i32
    %c0_i32_0 = arith.constant 0 : i32
    %c0_i32_1 = arith.constant 0 : i32
    %c0_i32_2 = arith.constant 0 : i32
    return %c0_i32, %c0_i32_0, %c0_i32_1 : i32, i32, i32
  }
  func.func @transform_5(%arg0: i32) -> (i32, i32, i32) {
    %c0_i32 = arith.constant 0 : i32
    %c0_i32_0 = arith.constant 0 : i32
    %c0_i32_1 = arith.constant 0 : i32
    %c0_i32_2 = arith.constant 0 : i32
    return %c0_i32, %c0_i32_0, %c0_i32_1 : i32, i32, i32
  }
  func.func @transform_6(%arg0: i32) -> (i32, i32, i32) {
    %c0_i32 = arith.constant 0 : i32
    %c0_i32_0 = arith.constant 0 : i32
    %c0_i32_1 = arith.constant 0 : i32
    %c0_i32_2 = arith.constant 0 : i32
    return %c0_i32, %c0_i32_0, %c0_i32_1 : i32, i32, i32
  }
  func.func @transform_7(%arg0: i32) -> (i32, i32, i32) {
    %c0_i32 = arith.constant 0 : i32
    %c0_i32_0 = arith.constant 0 : i32
    %c0_i32_1 = arith.constant 0 : i32
    %c0_i32_2 = arith.constant 0 : i32
    return %c0_i32, %c0_i32_0, %c0_i32_1 : i32, i32, i32
  }
  func.func @transform_8(%arg0: i32) -> (i32, i32, i32) {
    %c0_i32 = arith.constant 0 : i32
    %c0_i32_0 = arith.constant 0 : i32
    %c0_i32_1 = arith.constant 0 : i32
    %c0_i32_2 = arith.constant 0 : i32
    return %c0_i32, %c0_i32_0, %c0_i32_1 : i32, i32, i32
  }
  func.func @transform_9(%arg0: i32) -> (i32, i32, i32) {
    %c0_i32 = arith.constant 0 : i32
    %c0_i32_0 = arith.constant 0 : i32
    %c0_i32_1 = arith.constant 0 : i32
    %c0_i32_2 = arith.constant 0 : i32
    return %c0_i32, %c0_i32_0, %c0_i32_1 : i32, i32, i32
  }
  func.func @transform_10(%arg0: i32) -> (i32, i32, i32) {
    %c0_i32 = arith.constant 0 : i32
    %c0_i32_0 = arith.constant 0 : i32
    %c0_i32_1 = arith.constant 0 : i32
    %c0_i32_2 = arith.constant 0 : i32
    return %c0_i32, %c0_i32_0, %c0_i32_1 : i32, i32, i32
  }
  func.func @transform_11(%arg0: i32) -> (i32, i32, i32) {
    %c0_i32 = arith.constant 0 : i32
    %c0_i32_0 = arith.constant 0 : i32
    %c0_i32_1 = arith.constant 0 : i32
    %c0_i32_2 = arith.constant 0 : i32
    return %c0_i32, %c0_i32_0, %c0_i32_1 : i32, i32, i32
  }
  func.func @transform_12(%arg0: i32) -> (i32, i32, i32) {
    %c0_i32 = arith.constant 0 : i32
    %c0_i32_0 = arith.constant 0 : i32
    %c0_i32_1 = arith.constant 0 : i32
    %c0_i32_2 = arith.constant 0 : i32
    return %c0_i32, %c0_i32_0, %c0_i32_1 : i32, i32, i32
  }
  func.func @transform_13(%arg0: i32) -> (i32, i32, i32) {
    %c0_i32 = arith.constant 0 : i32
    %c0_i32_0 = arith.constant 0 : i32
    %c0_i32_1 = arith.constant 0 : i32
    %c0_i32_2 = arith.constant 0 : i32
    return %c0_i32, %c0_i32_0, %c0_i32_1 : i32, i32, i32
  }
  func.func @transform_14(%arg0: i32) -> (i32, i32, i32) {
    %c0_i32 = arith.constant 0 : i32
    %c0_i32_0 = arith.constant 0 : i32
    %c0_i32_1 = arith.constant 0 : i32
    %c0_i32_2 = arith.constant 0 : i32
    return %c0_i32, %c0_i32_0, %c0_i32_1 : i32, i32, i32
  }
  func.func @transform_15(%arg0: i32) -> (i32, i32, i32) {
    %c0_i32 = arith.constant 0 : i32
    %c0_i32_0 = arith.constant 0 : i32
    %c0_i32_1 = arith.constant 0 : i32
    %c0_i32_2 = arith.constant 0 : i32
    return %c0_i32, %c0_i32_0, %c0_i32_1 : i32, i32, i32
  }
  func.func @transform_16(%arg0: i32) -> (i32, i32) {
    %c0_i32 = arith.constant 0 : i32
    %c0_i32_0 = arith.constant 0 : i32
    %c0_i32_1 = arith.constant 0 : i32
    return %c0_i32, %c0_i32_0 : i32, i32
  }
  func.func @transform_17(%arg0: i32) -> (i32, i32) {
    %c0_i32 = arith.constant 0 : i32
    %c0_i32_0 = arith.constant 0 : i32
    %c0_i32_1 = arith.constant 0 : i32
    return %c0_i32, %c0_i32_0 : i32, i32
  }
  func.func @transform_18(%arg0: i32) -> (i32, i32, i32) {
    %c0_i32 = arith.constant 0 : i32
    %c0_i32_0 = arith.constant 0 : i32
    %c0_i32_1 = arith.constant 0 : i32
    return %arg0, %c0_i32, %c0_i32_0 : i32, i32, i32
  }
}

</mosaic_0001>

<bundles_post_ra>
// kernel: attention_sampler_forward.1
= control target key start
LH: loop header
LB: loop body
LE: loop exit
PB: predicated region body
PF: predicated region fallthrough
CT: control target
= control target key end

     0   :  { %s2567_s0 = inlined_call_operand.vmem [shape: f32[2,8,32], index: 0, kind: input, shape index: {}]   ;;  %s2568_s1 = inlined_call_operand.vmem [shape: f32[2,8,8], index: 1, kind: input, shape index: {}]   ;;  %s2569_s2 = inlined_call_operand.vmem [shape: f32[32,32], index: 2, kind: input, shape index: {}]   ;;  %s2570_s3 = inlined_call_operand.vmem [shape: f32[1,32], index: 3, kind: input, shape index: {}]   ;;  %s2571_s4 = inlined_call_operand.vmem [shape: f32[2,32,96], index: 4, kind: input, shape index: {}]   ;;  %s2572_s5 = inlined_call_operand.vmem [shape: f32[2,1,96], index: 5, kind: input, shape index: {}]   ;;  %s2573_s6 = inlined_call_operand.vmem [shape: f32[2,32,32], index: 6, kind: input, shape index: {}]   ;;  %s2574_s7 = inlined_call_operand.vmem [shape: f32[2,1,32], index: 7, kind: input, shape index: {}]   ;;  %s2575_s8 = inlined_call_operand.vmem [shape: f32[2,1,32], index: 8, kind: input, shape index: {}]   ;;  %s2576_s9 = inlined_call_operand.vmem [shape: f32[2,1,32], index: 9, kind: input, shape index: {}]   ;;  %s2577_s10 = inlined_call_operand.vmem [shape: f32[2,32,128], index: 10, kind: input, shape index: {}]   ;;  %s2578_s11 = inlined_call_operand.vmem [shape: f32[2,1,128], index: 11, kind: input, shape index: {}]   ;;  %s2579_s12 = inlined_call_operand.vmem [shape: f32[2,128,32], index: 12, kind: input, shape index: {}]   ;;  %s2580_s13 = inlined_call_operand.vmem [shape: f32[2,1,32], index: 13, kind: input, shape index: {}]   ;;  %s2581_s14 = inlined_call_operand.vmem [shape: f32[2,1,32], index: 14, kind: input, shape index: {}]   ;;  %s2582_s15 = inlined_call_operand.vmem [shape: f32[2,1,32], index: 15, kind: input, shape index: {}]   ;;  %s2583_s16 = inlined_call_operand.vmem [shape: f32[32,32], index: 16, kind: input, shape index: {}]   ;;  %s2584_s17 = inlined_call_operand.vmem [shape: f32[1,32], index: 17, kind: input, shape index: {}]   ;;  %s2585_s18 = inlined_call_operand.hbm [shape: f32[2,8,32], index: 18, kind: output, shape index: {}]  }
   0x1   :  { %2606 = sst [smem:[#allocation11_spill]] %s2567_s0 }
   0x2   :  { %2607 = sst [smem:[#allocation12_spill]] %s2568_s1 }
   0x3   :  { %2608 = sst [smem:[#allocation13_spill]] %s2569_s2 }
   0x4   :  { %2609 = sst [smem:[#allocation14_spill]] %s2570_s3 }
   0x5   :  { %23 = vsyncpa [#allocation3], 0 }
   0x6   :  { %25 = vsyncpa [#allocation3 + $0x1], 0  ;;  %s2082_s27 = smov 0   ;;  %s2084_s28 = smov 0  }
   0x7   :  { %s2086_s29 = smov 0   ;;  %s2088_s30 = smov 0  }
   0x8 LB: > { %2610 = sst [smem:[#allocation5_spill]] %s1958_s27  ;;  %s2103_s0 = sadd.s32 4294967295, %s1970_s30   ;;  %s1970_s30 = sphi %s2088_s30, %s2637_s30   ;;  %s1966_s29 = sphi %s2086_s29, %s2639_s29   ;;  %s1962_s28 = sphi %s2084_s28, %s2641_s28   ;;  %s1958_s27 = sphi %s2082_s27, %s2640_s27  }
   0x9   : > { %2611 = sst [smem:[#allocation6_spill]] %s1966_s29  ;;  %s1715_s19 = sadd.s32 4294967294, %s1970_s30  }
   0xa   : > { %2612 = sst [smem:[#allocation7_spill]] %s1970_s30  ;;  %s2107_s1 = sadd.s32 1, %s1970_s30  }
   0xb   : > { %2613 = sst [smem:[#allocation8_spill]] %s2107_s1  ;;  %s426_s20 = sadd.s32 1, %s1966_s29 }
   0xc   : > { %s423_s21 = ssub.s32 %s1970_s30, %s2107_s1  ;;  %p436_p0 = scmp.ne.s32.totalorder %s1966_s29, %s1962_s28 }
   0xd   : > { %p424_p1 = scmp.eq.s32.totalorder %s423_s21, 0  ;;  %p437_p2 = scmp.eq.s32.totalorder %s2103_s0, 1 }
   0xe   : > { %p442_p3 = scmp.ne.s32.totalorder %s1962_s28, %s1958_s27  ;;  %p443_p4 = scmp.eq.s32.totalorder %s1715_s19, 1 }
   0xf   : > { %s2118_s22 = scalar_select %p424_p1, %s1966_s29, %s426_s20  }
  0x10   : > { %p2120_p5 = por %p437_p2, %p436_p0  ;;  %p2124_p6 = por %p443_p4, %p442_p3 }
  0x11   : > { %2614 = sst [smem:[#allocation9_spill]] %s2118_s22  ;;  %p1718_p7 = scmp.ge.s32.totalorder %s1970_s30, 1 }
  0x12   : > { %s2616_s23 = scalar_select %p2124_p6, 1, 0 }
  0x13   : > { %p523_p8 = scmp.lt.s32.totalorder %s1970_s30, 3 }
  0x14   : > { %2617 = sst [smem:[#allocation10_spill]] %s2616_s23 }
  0x15   : > { %p524_p9 = pnand %p1718_p7, %p523_p8 }
  0x16   : > { %s2618_s26 = sld [smem:[#allocation13_spill]] (!%p524_p9)  ;;  %p580_p10 = scmp.lt.s32.totalorder (!%p524_p9), %s2103_s0, 1 }
  0x17   : > { %527 = sbr.rel (%p524_p9) target bundleno = 4727 (0x1277), region = 92  ;;  %s2619_s20 = sld [smem:[#allocation11_spill]] (!%p524_p9) }
  0x18   : > { %s2620_s3 = sld [smem:[#allocation14_spill]] (!%p524_p9)  ;;  %s1972_s30 = smov (!%p524_p9), 88  }
  0x19   : > { %s2598_s23 = smov (!%p524_p9), 72   ;;  %s2594_s21 = smov (!%p524_p9), 104  }
  0x1a   : > { %s2601_s25 = smov (!%p524_p9), 80   ;;  %s2621_s1 = sld [smem:[#allocation12_spill]] (!%p524_p9) }
  0x1b   : > { %s2597_s19 = smov (!%p524_p9), 56   ;;  %s2602_s29 = smov (!%p524_p9), 8  }
  0x1c   : > { %v593_v0 = vld [vmem:[%s2618_s26 + $0x18] sm:$0xff]  ;;  %v592_v1 = vld [vmem:[%s2618_s26 + $0x10] sm:$0xff]  ;;  %v591_v4 = vld [vmem:[%s2618_s26 + $0x8] sm:$0xff]  ;;  %s2147_s24 = scalar_select %p580_p10, %s2103_s0, 1  ;;  %vm598_vm0 = vcmask 261120   ;;  %vm657_vm1 = vcmask 64512  }
  0x1d   : > { %614 = vmatpush.msra.mxu0 %v593_v0  ;;  %v625_v2 = vld [vmem:[%s2571_s4 + $0x18] sm:$0xff]  ;;  %v624_v3 = vld [vmem:[%s2571_s4 + $0x10] sm:$0xff]  ;;  %v590_v5 = vld [vmem:[%s2618_s26] sm:$0xff]  ;;  %s1974_s26 = smov 96   ;;  %vm928_vm2 = vcmask 130048   ;;  %vm930_vm3 = vcmask 195584  }
  0x1e   : > { %645 = vmatpush.msra.mxu2 %v625_v2  ;;  %s1720_s22 = sshll.u32 %s2147_s24, 3  ;;  %v623_v7 = vld [vmem:[%s2571_s4 + $0x8] sm:$0xff]  ;;  %v622_v8 = vld [vmem:[%s2571_s4] sm:$0xff]  ;;  %s2599_s24 = smov 112  }
  0x1f   : > { %615 = vmatpush.msra.mxu0 %v592_v1  ;;  %s583_s27 = scalar_lea.vmem %s2619_s20, %s1720_s22  ;;  %v1848_v9 = vld [vmem:[%s2620_s3] ss:$0 sm:$0xff]  ;;  %s2600_s20 = smov 64  }
  0x20   : > { %646 = vmatpush.msra.mxu2 %v624_v3  ;;  %v588_v6 = vld [vmem:[%s583_s27] sm:$0xff]  ;;  %s2605_s27 = smov 120  }
  0x21   : > { %616 = vmatpush.msra.mxu0 %v591_v4  ;;  %v1849_v12 = vld [vmem:[%s2572_s5] ss:$0 sm:$0xff] }
  0x22   : > { %647 = vmatpush.msra.mxu2 %v623_v7 }
  0x23   : > { %617 = vmatpush.msra.mxu0 %v590_v5 }
  0x24   : > { %1722 = vmatmul.msk.f32.vlgmr.msra.gmra.mxu0 %vm598_vm0, %v588_v6  ;;  %648 = vmatpush.msra.mxu2 %v622_v8 }
  0xa1   : > { %v619_v10 = vpop.f32.mrf.mxu0 }
  0xa2   : > { %v2168_v11 = vadd.f32 %v1848_v9, %v619_v10 }
  0xa4   : > { %1723 = vmatmul.msk.f32.vlgmr.msra.gmra.mxu2 %vm598_vm0, %v2168_v11 }
 0x127   : > { %v650_v13 = vpop.f32.mrf.mxu2 }
 0x128   : > { %v2175_v14 = vadd.f32 %v1849_v12, %v650_v13  ;;  %v935_v13 = vld [vmem:[%s2573_s6 + $0x18] sm:$0xff] }
 0x12a   : > { %722 = vrot.lane.b32.xlu2 %v2175_v14, %s1972_s30  ;;  %694 = vrot.lane.b32.xlu1 %v2175_v14, %s2600_s20  ;;  %v653_v15 = vmul.f32 0.35355338, %v2175_v14  ;;  %s2630_s20 = smov 40  }
 0x12b   : > { %655 = vrot.lane.b32.xlu0 %v2175_v14, %s1974_s26 }
 0x132   : > { %720 = vrot.lane.b32.xlu2 %v653_v15, %s2605_s27  ;;  %s2628_s27 = smov 56  }
 0x13a   : > { %852 = vrot.lane.b32.xlu2 %v2175_v14, %s2598_s23  ;;  %s2631_s23 = smov 8  }
 0x142   : > { %850 = vrot.lane.b32.xlu2 %v653_v15, %s2594_s21  ;;  %s587_s21 = scalar_lea.vmem %s2621_s1, %s1720_s22  ;;  %s2595_s22 = smov 40  }
 0x143   : > { %v2199_v23 = vld [vmem:[%s587_s21] sm:$0xff]  ;;  %s2596_s21 = smov 48   ;;  %s2603_s1 = smov 16  }
 0x14a   : > { %787 = vrot.lane.b32.xlu2 %v2175_v14, %s2601_s25  ;;  %s577_s25 = sand.u32 1, %s1962_s28  }
 0x184   : > { %v723_v16 = vpop.permute.xlu2 %722 }
 0x18c   : > { %v721_v17 = vpop.permute.xlu2 %720 }
 0x194   : > { %v853_v18 = vpop.permute.xlu2 %852 }
 0x19c   : > { %v695_v19 = vpop.permute.xlu1 %694  ;;  %v851_v20 = vpop.permute.xlu2 %850 }
 0x19d   : > { %v656_v21 = vpop.permute.xlu0 %655  ;;  %715 = vmatpush.msra.mxu3 %v695_v19 }
 0x19e   : > { %1724 = vmatpush.xpose.msk.msrb.mxu2 %vm657_vm1, %v656_v21 }
 0x19f   : > { %1727 = vmatpush.xpose.msk.msrb.mxu3 %vm657_vm1, %v723_v16  ;;  %v932_v16 = vld [vmem:[%s2573_s6] sm:$0xff] }
 0x1a1   : > { %1725 = vmatmul.msk.f32.vlgmr.msrb.gmra.mxu2 %vm657_vm1, %v653_v15 }
 0x1a4   : > { %v788_v22 = vpop.permute.xlu2 %787 }
 0x1a5   : > { %1730 = vmatpush.xpose.msk.msrb.mxu0 %vm657_vm1, %v788_v22 }
 0x224   : > { %v680_v24 = vpop.f32.mrf.mxu2 }
 0x225   : > { %v681_v25 = vadd.f32 %v680_v24, %v2199_v23  ;;  %v1850_v24 = vld [vmem:[%s2574_s7] ss:$0 sm:$0xff] }
 0x227   : > { %v683_v26 = vsel %vm657_vm1, %v681_v25, -inf }
 0x228   : > { %684 = vmax.xlane.f32.xlu0 %v683_v26 }
 0x29b   : > { %v685_v27 = vpop.xlane.xlu0 %684 }
 0x29c   : > { %v686_v28 = vsub.f32 %v681_v25, %v685_v27 }
 0x29e   : > { %v687_v29 = vmul.f32 1.442695, %v686_v28 }
 0x2a0   : > { %1866 = vpow2.f32 %v687_v29  ;;  %v1986_v29 = vmov 32.0  }
 0x2a6   : > { %v1867_v30 = vpop.eup %1866 }
 0x2a7   : > { %v689_v31 = vsel %vm657_vm1, %v1867_v30, 0.0 }
 0x2a8   : > { %690 = vadd.xlane.f32.xlu1 %v689_v31 }
 0x2c1   : > { %785 = vrot.lane.b32.xlu1 %v653_v15, %s2599_s24  ;;  %v933_v15 = vld [vmem:[%s2573_s6 + $0x8] sm:$0xff]  ;;  %s1719_s24 = sshll.u32 %s577_s25, 3 }
 0x31b   : > { %v691_v32 = vpop.xlane.xlu1 %690 }
 0x31c   : > { %1868 = vrcp.f32 %v691_v32 }
 0x322   : > { %v1869_v33 = vpop.eup %1868 }
 0x323   : > { %v693_v34 = vmul.f32 %v1869_v33, %v1867_v30 }
 0x325   : > { %1726 = vmatmul.msk.f32.vlgmr.msra.gmra.mxu3 %vm657_vm1, %v693_v34 }
 0x326   : > { %1733 = vmatpush.xpose.msk.msra.mxu3 %vm657_vm1, %v853_v18 }
 0x32d   : > { %1728 = vmatmul.msk.f32.vlgmr.msrb.gmra.mxu3 %vm657_vm1, %v721_v17 }
 0x333   : > { %v786_v35 = vpop.permute.xlu1 %785 }
 0x334   : > { %1731 = vmatmul.msk.f32.vlgmr.msrb.gmra.mxu0 %vm657_vm1, %v786_v35 }
 0x335   : > { %1734 = vmatmul.msk.f32.vlgmr.msra.gmra.mxu3 %vm657_vm1, %v851_v20 }
 0x3a8   : > { %v2210_v36 = vpop.f32.mrf.mxu3 }
 0x3b0   : > { %v745_v37 = vpop.f32.mrf.mxu3 }
 0x3b1   : > { %v746_v38 = vadd.f32 %v745_v37, %v2199_v23  ;;  %v810_v39 = vpop.f32.mrf.mxu0 }
 0x3b2   : > { %v811_v40 = vadd.f32 %v810_v39, %v2199_v23 }
 0x3b3   : > { %v748_v41 = vsel %vm657_vm1, %v746_v38, -inf }
 0x3b4   : > { %749 = vmax.xlane.f32.xlu2 %v748_v41  ;;  %v813_v42 = vsel %vm657_vm1, %v811_v40, -inf  ;;  %v1005_v41 = vld [vmem:[%s2577_s10 + $0x10] sm:$0xff] }
 0x3b5   : > { %814 = vmax.xlane.f32.xlu0 %v813_v42  ;;  %v1004_v42 = vld [vmem:[%s2577_s10 + $0x8] sm:$0xff] }
 0x3b8   : > { %v875_v43 = vpop.f32.mrf.mxu3 }
 0x3b9   : > { %v876_v44 = vadd.f32 %v875_v43, %v2199_v23  ;;  %v1003_v43 = vld [vmem:[%s2577_s10] sm:$0xff] }
 0x3bb   : > { %v878_v45 = vsel %vm657_vm1, %v876_v44, -inf }
 0x3bc   : > { %879 = vmax.xlane.f32.xlu1 %v878_v45  ;;  %v1049_v45 = vld [vmem:[%s2579_s12 + $0x70] sm:$0xff] }
 0x3d5   : > { %889 = vrot.lane.b32.xlu1 %v2175_v14, %s2595_s22  ;;  %s2604_s22 = smov 24  }
 0x427   : > { %v750_v46 = vpop.xlane.xlu2 %749 }
 0x428   : > { %v751_v47 = vsub.f32 %v746_v38, %v750_v46  ;;  %v815_v48 = vpop.xlane.xlu0 %814  ;;  %v1048_v46 = vld [vmem:[%s2579_s12 + $0x68] sm:$0xff] }
 0x429   : > { %v816_v49 = vsub.f32 %v811_v40, %v815_v48  ;;  %v1006_v40 = vld [vmem:[%s2577_s10 + $0x18] sm:$0xff] }
 0x42a   : > { %v752_v50 = vmul.f32 1.442695, %v751_v47  ;;  %1026 = vmatpush.msra.mxu1 %v1006_v40  ;;  %v1855_v40 = vld [vmem:[%s2581_s14] ss:$0 sm:$0xff] }
 0x42b   : > { %v817_v51 = vmul.f32 1.442695, %v816_v49  ;;  %v1047_v49 = vld [vmem:[%s2579_s12 + $0x60] sm:$0xff] }
 0x42c   : > { %1870 = vpow2.f32 %v752_v50  ;;  %1027 = vmatpush.msra.mxu1 %v1005_v41 }
 0x42d   : > { %1872 = vpow2.f32 %v817_v51  ;;  %v1046_v51 = vld [vmem:[%s2579_s12 + $0x58] sm:$0xff] }
 0x42e   : > { %1028 = vmatpush.msra.mxu1 %v1004_v42 }
 0x42f   : > { %v880_v52 = vpop.xlane.xlu1 %879 }
 0x430   : > { %v881_v53 = vsub.f32 %v876_v44, %v880_v52  ;;  %1029 = vmatpush.msra.mxu1 %v1003_v43  ;;  %v1050_v44 = vld [vmem:[%s2579_s12 + $0x78] sm:$0xff]  ;;  %v1045_v52 = vld [vmem:[%s2579_s12 + $0x50] sm:$0xff]  ;;  %v1856_v43 = vld [vmem:[%s2582_s15] ss:$0 sm:$0xff] }
 0x431   : > { %1055 = vmatpush.msrb.mxu3 %v1050_v44 }
 0x432   : > { %v1871_v54 = vpop.eup %1870  ;;  %v882_v55 = vmul.f32 1.442695, %v881_v53  ;;  %v1044_v53 = vld [vmem:[%s2579_s12 + $0x48] sm:$0xff] }
 0x433   : > { %v1873_v56 = vpop.eup %1872  ;;  %v754_v57 = vsel %vm657_vm1, %v1871_v54, 0.0  ;;  %1056 = vmatpush.msrb.mxu3 %v1049_v45 }
 0x434   : > { %1874 = vpow2.f32 %v882_v55  ;;  %755 = vadd.xlane.f32.xlu0 %v754_v57  ;;  %v819_v58 = vsel %vm657_vm1, %v1873_v56, 0.0 }
 0x435   : > { %820 = vadd.xlane.f32.xlu2 %v819_v58  ;;  %1057 = vmatpush.msrb.mxu3 %v1048_v46  ;;  %v1041_v58 = vld [vmem:[%s2579_s12 + $0x30] sm:$0xff]  ;;  %v1857_v46 = vld [vmem:[%s2572_s5 + $0x1] ss:$0 sm:$0xff] }
 0x437   : > { %1058 = vmatpush.msrb.mxu3 %v1047_v49 }
 0x439   : > { %1059 = vmatpush.msrb.mxu3 %v1046_v51 }
 0x43a   : > { %v1875_v59 = vpop.eup %1874 }
 0x43b   : > { %v884_v60 = vsel %vm657_vm1, %v1875_v59, 0.0  ;;  %1060 = vmatpush.msrb.mxu3 %v1045_v52 }
 0x43c   : > { %885 = vadd.xlane.f32.xlu0 %v884_v60  ;;  %v1040_v60 = vld [vmem:[%s2579_s12 + $0x28] sm:$0xff] }
 0x43d   : > { %1061 = vmatpush.msrb.mxu3 %v1044_v53 }
 0x447   : > { %v890_v6 = vpop.permute.xlu1 %889 }
 0x44d   : > { %824 = vrot.lane.b32.xlu2 %v2175_v14, %s2596_s21  ;;  %s2622_s21 = smov 120  }
 0x450   : > { %759 = vrot.lane.b32.xlu0 %v2175_v14, %s2597_s19  ;;  %v934_v14 = vld [vmem:[%s2573_s6 + $0x10] sm:$0xff]  ;;  %s2623_s19 = smov 80  }
 0x4a7   : > { %v756_v63 = vpop.xlane.xlu0 %755 }
 0x4a8   : > { %v821_v61 = vpop.xlane.xlu2 %820 }
 0x4a9   : > { %1876 = vrcp.f32 %v821_v61 }
 0x4aa   : > { %1878 = vrcp.f32 %v756_v63 }
 0x4af   : > { %v1877_v62 = vpop.eup %1876  ;;  %v886_v2 = vpop.xlane.xlu0 %885 }
 0x4b0   : > { %v823_v0 = vmul.f32 %v1877_v62, %v1873_v56  ;;  %v825_v1 = vpop.permute.xlu2 %824  ;;  %v1879_v3 = vpop.eup %1878  ;;  %1880 = vrcp.f32 %v886_v2  ;;  %v1042_v56 = vld [vmem:[%s2579_s12 + $0x38] sm:$0xff]  ;;  %v1039_v62 = vld [vmem:[%s2579_s12 + $0x20] sm:$0xff] }
 0x4b1   : > { %845 = vmatpush.msra.mxu0 %v825_v1  ;;  %v758_v4 = vmul.f32 %v1879_v3, %v1871_v54  ;;  %1882 = vrcp.f32 %v1986_v29  ;;  %v1043_v54 = vld [vmem:[%s2579_s12 + $0x40] sm:$0xff]  ;;  %v1739_v29 = vld [vmem:[%s2571_s4 + $0x28] sm:$0xff] }
 0x4b2   : > { %1732 = vmatmul.msk.f32.vlgmr.msra.gmra.mxu0 %vm657_vm1, %v823_v0  ;;  %1062 = vmatpush.msrb.mxu3 %v1043_v54  ;;  %v1038_v0 = vld [vmem:[%s2579_s12 + $0x18] sm:$0xff]  ;;  %v1851_v2 = vld [vmem:[%s2575_s8] ss:$0 sm:$0xff] }
 0x4b3   : > { %955 = vmatpush.msrb.mxu0 %v935_v13 }
 0x4b4   : > { %1063 = vmatpush.msrb.mxu3 %v1042_v56 }
 0x4b5   : > { %956 = vmatpush.msrb.mxu0 %v934_v14 }
 0x4b6   : > { %v1881_v7 = vpop.eup %1880  ;;  %1064 = vmatpush.msrb.mxu3 %v1041_v58 }
 0x4b7   : > { %v888_v8 = vmul.f32 %v1881_v7, %v1875_v59  ;;  %957 = vmatpush.msrb.mxu0 %v933_v15  ;;  %v1883_v30 = vpop.eup %1882 }
 0x4b8   : > { %v970_v31 = vmul.f32 32.0, %v1883_v30  ;;  %vm974_vm4 = vweird.f32 %v1883_v30  ;;  %1065 = vmatpush.msrb.mxu3 %v1040_v60 }
 0x4b9   : > { %958 = vmatpush.msrb.mxu0 %v932_v16  ;;  %v1854_v16 = vld [vmem:[%s2580_s13] ss:$0 sm:$0xff] }
 0x4ba   : > { %v971_v32 = vsub.f32 1.0, %v970_v31  ;;  %1066 = vmatpush.msrb.mxu3 %v1039_v62 }
 0x4bc   : > { %v972_v33 = vmul.f32 %v1883_v30, %v971_v32  ;;  %1067 = vmatpush.msrb.mxu3 %v1038_v0 }
 0x4be   : > { %v973_v34 = vadd.f32 %v1883_v30, %v972_v33 }
 0x4c0   : > { %v2255_v35 = vsel %vm974_vm4, %v1883_v30, %v973_v34  ;;  %v1738_v30 = vld [vmem:[%s2571_s4 + $0x20] sm:$0xff] }
 0x4c2   : > { %v760_v5 = vpop.permute.xlu0 %759 }
 0x4c3   : > { %780 = vmatpush.msra.mxu2 %v760_v5  ;;  %v1852_v5 = vld [vmem:[%s2576_s9] ss:$0 sm:$0xff] }
 0x4c4   : > { %1729 = vmatmul.msk.f32.vlgmr.msra.gmra.mxu2 %vm657_vm1, %v758_v4 }
 0x4c5   : > { %910 = vmatpush.msrb.mxu2 %v890_v6 }
 0x4cc   : > { %1735 = vmatmul.msk.f32.vlgmr.msrb.gmra.mxu2 %vm657_vm1, %v888_v8  ;;  %v1037_v8 = vld [vmem:[%s2579_s12 + $0x10] sm:$0xff] }
 0x4cd   : > { %1068 = vmatpush.msrb.mxu3 %v1037_v8 }
 0x52f   : > { %v847_v10 = vpop.f32.mrf.mxu0 }
 0x547   : > { %v782_v9 = vpop.f32.mrf.mxu2 }
 0x548   : > { %916 = vrot.lane.b32.xlu0 %v782_v9, %s2602_s29  ;;  %v1036_v9 = vld [vmem:[%s2579_s12 + $0x8] sm:$0xff]  ;;  %s2626_s29 = smov 72  }
 0x549   : > { %1069 = vmatpush.msrb.mxu3 %v1036_v9 }
 0x54f   : > { %v912_v12 = vpop.f32.mrf.mxu2 }
 0x550   : > { %920 = vrot.lane.b32.xlu0 %v847_v10, %s2603_s1  ;;  %924 = vrot.lane.b32.xlu1 %v912_v12, %s2604_s22  ;;  %v1035_v10 = vld [vmem:[%s2579_s12] sm:$0xff]  ;;  %s2627_s1 = smov 104   ;;  %s2629_s22 = smov 48  }
 0x551   : > { %1070 = vmatpush.msrb.mxu3 %v1035_v10  ;;  %v1853_v12 = vld [vmem:[%s2578_s11] ss:$0 sm:$0xff] }
 0x5ba   : > { %v917_v17 = vpop.permute.xlu0 %916 }
 0x5bb   : > { %v927_v18 = vsel %vm657_vm1, %v2210_v36, %v917_v17 }
 0x5c2   : > { %v921_v19 = vpop.permute.xlu0 %920  ;;  %v925_v20 = vpop.permute.xlu1 %924 }
 0x5c3   : > { %v929_v21 = vsel %vm928_vm2, %v927_v18, %v921_v19 }
 0x5c4   : > { %v931_v22 = vsel %vm930_vm3, %v929_v21, %v925_v20 }
 0x5c5   : > { %1736 = vmatmul.msk.f32.vlgmr.msrb.gmra.mxu0 %vm598_vm0, %v931_v22 }
 0x642   : > { %v960_v25 = vpop.f32.mrf.mxu0 }
 0x643   : > { %v961_v26 = vadd.f32 %v1850_v24, %v960_v25 }
 0x645   : > { %v963_v27 = vadd.f32 %v961_v26, %v2168_v11 }
 0x647   : > { %v966_v28 = vsel %vm598_vm0, %v963_v27, 0.0 }
 0x648   : > { %967 = vadd.xlane.f32.xlu0 %v966_v28  ;;  %v1740_v28 = vld [vmem:[%s2571_s4 + $0x30] sm:$0xff] }
 0x6bb   : > { %v968_v36 = vpop.xlane.xlu0 %967 }
 0x6bc   : > { %v976_v37 = vmul.f32 %v2255_v35, %v968_v36 }
 0x6be   : > { %v977_v38 = vsub.f32 %v963_v27, %v976_v37  ;;  %v1741_v27 = vld [vmem:[%s2571_s4 + $0x38] sm:$0xff] }
 0x6bf   : > { %1133 = vmatpush.msra.mxu2 %v1741_v27 }
 0x6c0   : > { %v978_v39 = vmul.f32 %v977_v38, %v977_v38 }
 0x6c1   : > { %1134 = vmatpush.msra.mxu2 %v1740_v28 }
 0x6c2   : > { %v979_v11 = vsel %vm598_vm0, %v978_v39, 0.0 }
 0x6c3   : > { %980 = vadd.xlane.f32.xlu2 %v979_v11  ;;  %1135 = vmatpush.msra.mxu2 %v1739_v29 }
 0x6c5   : > { %1136 = vmatpush.msra.mxu2 %v1738_v30 }
 0x736   : > { %v981_v47 = vpop.xlane.xlu2 %980 }
 0x737   : > { %v982_v48 = vmul.f32 %v981_v47, %v2255_v35 }
 0x739   : > { %v983_v50 = vadd.f32 1e-05, %v982_v48 }
 0x73b   : > { %1884 = vrsqrt.f32 %v983_v50  ;;  %vm990_vm6 = vweird.f32 %v983_v50 }
 0x741   : > { %v1885_v55 = vpop.eup %1884 }
 0x742   : > { %v985_v57 = vmul.f32 %v1885_v55, %v983_v50  ;;  %vm991_vm5 = vweird.f32 %v1885_v55 }
 0x743   : > { %vm992_vm7 = vmor %vm990_vm6, %vm991_vm5 }
 0x744   : > { %v986_v59 = vmul.f32 %v1885_v55, %v985_v57 }
 0x746   : > { %v987_v61 = vmul.f32 0.5, %v986_v59 }
 0x748   : > { %v988_v63 = vsub.f32 1.5, %v987_v61 }
 0x74a   : > { %v989_v1 = vmul.f32 %v1885_v55, %v988_v63 }
 0x74c   : > { %v993_v3 = vsel %vm992_vm7, %v1885_v55, %v989_v1 }
 0x74d   : > { %v994_v4 = vmul.f32 %v993_v3, %v977_v38 }
 0x74f   : > { %v998_v6 = vmul.f32 %v1851_v2, %v994_v4 }
 0x751   : > { %v1002_v7 = vadd.f32 %v1852_v5, %v998_v6 }
 0x753   : > { %1737 = vmatmul.msk.f32.vlgmr.msra.gmra.mxu1 %vm598_vm0, %v1002_v7 }
 0x7d0   : > { %v1031_v13 = vpop.f32.mrf.mxu1 }
 0x7d1   : > { %v1032_v14 = vadd.f32 %v1853_v12, %v1031_v13 }
 0x7d3   : > { %v1034_v15 = vmax.f32 %v1032_v14, 0.0 }
 0x7d5   : > { %1071 = vmatmul.f32.vlgmr.msrb.gmra.mxu3 %v1034_v15 }
 0x858   : > { %v1072_v17 = vpop.f32.mrf.mxu3 }
 0x859   : > { %v1073_v18 = vadd.f32 %v1854_v16, %v1072_v17 }
 0x85b   : > { %v1075_v19 = vadd.f32 %v1073_v18, %v1002_v7 }
 0x85d   : > { %v1078_v20 = vsel %vm598_vm0, %v1075_v19, 0.0 }
 0x85e   : > { %1079 = vadd.xlane.f32.xlu1 %v1078_v20 }
 0x8d1   : > { %v1080_v21 = vpop.xlane.xlu1 %1079 }
 0x8d2   : > { %v1081_v22 = vmul.f32 %v1080_v21, %v2255_v35 }
 0x8d4   : > { %v1082_v24 = vsub.f32 %v1075_v19, %v1081_v22 }
 0x8d6   : > { %v1083_v25 = vmul.f32 %v1082_v24, %v1082_v24 }
 0x8d8   : > { %v1084_v26 = vsel %vm598_vm0, %v1083_v25, 0.0 }
 0x8d9   : > { %1085 = vadd.xlane.f32.xlu0 %v1084_v26 }
 0x94c   : > { %v1086_v31 = vpop.xlane.xlu0 %1085 }
 0x94d   : > { %v1087_v32 = vmul.f32 %v1086_v31, %v2255_v35 }
 0x94f   : > { %v1088_v33 = vadd.f32 1e-05, %v1087_v32 }
 0x951   : > { %1886 = vrsqrt.f32 %v1088_v33  ;;  %vm1095_vm9 = vweird.f32 %v1088_v33 }
 0x957   : > { %v1887_v34 = vpop.eup %1886 }
 0x958   : > { %v1090_v36 = vmul.f32 %v1887_v34, %v1088_v33  ;;  %vm1096_vm8 = vweird.f32 %v1887_v34 }
 0x959   : > { %vm1097_vm10 = vmor %vm1095_vm9, %vm1096_vm8 }
 0x95a   : > { %v1091_v37 = vmul.f32 %v1887_v34, %v1090_v36 }
 0x95c   : > { %v1092_v38 = vmul.f32 0.5, %v1091_v37 }
 0x95e   : > { %v1093_v39 = vsub.f32 1.5, %v1092_v38 }
 0x960   : > { %v1094_v11 = vmul.f32 %v1887_v34, %v1093_v39 }
 0x962   : > { %v1098_v41 = vsel %vm1097_vm10, %v1887_v34, %v1094_v11 }
 0x963   : > { %v1099_v42 = vmul.f32 %v1098_v41, %v1082_v24 }
 0x965   : > { %v1103_v44 = vmul.f32 %v1855_v40, %v1099_v42 }
 0x967   : > { %v2355_v45 = vadd.f32 %v1856_v43, %v1103_v44  ;;  %v1759_v44 = vld [vmem:[%s2573_s6 + $0x38] sm:$0xff] }
 0x969   : > { %1743 = vmatmul.msk.f32.vlgmr.msra.gmra.mxu2 %vm598_vm0, %v2355_v45 }
 0x9ec   : > { %v1138_v47 = vpop.f32.mrf.mxu2 }
 0x9ed   : > { %v2362_v48 = vadd.f32 %v1857_v46, %v1138_v47  ;;  %v1758_v46 = vld [vmem:[%s2573_s6 + $0x30] sm:$0xff]  ;;  %v1757_v47 = vld [vmem:[%s2573_s6 + $0x28] sm:$0xff] }
 0x9ef   : > { %1209 = vrot.lane.b32.xlu1 %v2362_v48, %s1972_s30  ;;  %1143 = vrot.lane.b32.xlu2 %v2362_v48, %s1974_s26  ;;  %v1141_v49 = vmul.f32 0.35355338, %v2362_v48  ;;  %s2624_s30 = smov 64   ;;  %s2625_s26 = smov 112  }
 0x9f1   : > { %1207 = vrot.lane.b32.xlu0 %v1141_v49, %s2622_s21  ;;  %s1791_s21 = sshll.u32 %s2103_s0, 3 }
 0x9f7   : > { %1274 = vrot.lane.b32.xlu1 %v2362_v48, %s2623_s19 }
 0xa49   : > { %v1144_v50 = vpop.permute.xlu2 %1143 }
 0xa4a   : > { %1744 = vmatpush.xpose.msk.msra.mxu0 %vm657_vm1, %v1144_v50  ;;  %v1756_v50 = vld [vmem:[%s2573_s6 + $0x20] sm:$0xff] }
 0xa4d   : > { %1745 = vmatmul.msk.f32.vlgmr.msra.gmra.mxu0 %vm657_vm1, %v1141_v49 }
 0xa61   : > { %v1210_v51 = vpop.permute.xlu1 %1209 }
 0xa62   : > { %1747 = vmatpush.xpose.msk.msrb.mxu2 %vm657_vm1, %v1210_v51 }
 0xa63   : > { %v1208_v52 = vpop.permute.xlu0 %1207 }
 0xa65   : > { %1748 = vmatmul.msk.f32.vlgmr.msrb.gmra.mxu2 %vm657_vm1, %v1208_v52 }
 0xa69   : > { %v1275_v6 = vpop.permute.xlu1 %1274 }
 0xaca   : > { %v1167_v53 = vpop.f32.mrf.mxu0 }
 0xacb   : > { %v1168_v54 = vadd.f32 %v1167_v53, %v2199_v23 }
 0xacd   : > { %v1170_v55 = vsel %vm657_vm1, %v1168_v54, -inf }
 0xace   : > { %1171 = vmax.xlane.f32.xlu2 %v1170_v55 }
 0xae8   : > { %v1232_v56 = vpop.f32.mrf.mxu2 }
 0xae9   : > { %v1233_v57 = vadd.f32 %v1232_v56, %v2199_v23 }
 0xaeb   : > { %v1235_v58 = vsel %vm657_vm1, %v1233_v57, -inf }
 0xaec   : > { %1236 = vmax.xlane.f32.xlu0 %v1235_v58 }
 0xb00   : > { %1181 = vrot.lane.b32.xlu0 %v2362_v48, %s2624_s30 }
 0xb08   : > { %1272 = vrot.lane.b32.xlu0 %v1141_v49, %s2625_s26  ;;  %s1639_s26 = scalar_lea.hbm %s2585_s18, %s1791_s21 }
 0xb10   : > { %1339 = vrot.lane.b32.xlu0 %v2362_v48, %s2626_s29  ;;  %s2632_s29 = smov 16  }
 0xb41   : > { %v1172_v59 = vpop.xlane.xlu2 %1171 }
 0xb42   : > { %v1173_v60 = vsub.f32 %v1168_v54, %v1172_v59 }
 0xb44   : > { %v1174_v61 = vmul.f32 1.442695, %v1173_v60 }
 0xb46   : > { %1888 = vpow2.f32 %v1174_v61 }
 0xb4c   : > { %v1889_v62 = vpop.eup %1888 }
 0xb4d   : > { %v1176_v63 = vsel %vm657_vm1, %v1889_v62, 0.0 }
 0xb4e   : > { %1177 = vadd.xlane.f32.xlu1 %v1176_v63 }
 0xb5f   : > { %v1237_v0 = vpop.xlane.xlu0 %1236 }
 0xb60   : > { %v1238_v1 = vsub.f32 %v1233_v57, %v1237_v0  ;;  %v1858_v57 = vld [vmem:[%s2574_s7 + $0x1] ss:$0 sm:$0xff] }
 0xb62   : > { %v1239_v2 = vmul.f32 1.442695, %v1238_v1 }
 0xb64   : > { %1890 = vpow2.f32 %v1239_v2 }
 0xb67   : > { %1337 = vrot.lane.b32.xlu1 %v1141_v49, %s2627_s1  ;;  %s2633_s1 = smov 24  }
 0xb6a   : > { %v1891_v3 = vpop.eup %1890 }
 0xb6b   : > { %v1241_v4 = vsel %vm657_vm1, %v1891_v3, 0.0 }
 0xb6c   : > { %1242 = vadd.xlane.f32.xlu2 %v1241_v4  ;;  %v1765_v4 = vld [vmem:[%s2577_s10 + $0x28] sm:$0xff] }
 0xb72   : > { %v1182_v5 = vpop.permute.xlu0 %1181 }
 0xb73   : > { %1202 = vmatpush.msrb.mxu1 %v1182_v5  ;;  %v1764_v5 = vld [vmem:[%s2577_s10 + $0x20] sm:$0xff] }
 0xb75   : > { %1750 = vmatpush.xpose.msk.msra.mxu1 %vm657_vm1, %v1275_v6  ;;  %v1785_v6 = vld [vmem:[%s2579_s12 + $0xf8] sm:$0xff] }
 0xb7a   : > { %v1273_v10 = vpop.permute.xlu0 %1272 }
 0xb82   : > { %v1340_v16 = vpop.permute.xlu0 %1339 }
 0xb84   : > { %1246 = vrot.lane.b32.xlu2 %v2362_v48, %s2628_s27  ;;  %s579_s27 = scalar_lea.vmem [#allocation2], %s1719_s24  ;;  %s1928_s24 = scalar_lea.hbm %s2585_s18, 16 }
 0xbc1   : > { %v1178_v7 = vpop.xlane.xlu1 %1177 }
 0xbc2   : > { %1892 = vrcp.f32 %v1178_v7  ;;  %v1784_v7 = vld [vmem:[%s2579_s12 + $0xf0] sm:$0xff] }
 0xbc8   : > { %v1893_v8 = vpop.eup %1892 }
 0xbc9   : > { %v1180_v9 = vmul.f32 %v1893_v8, %v1889_v62  ;;  %v1783_v8 = vld [vmem:[%s2579_s12 + $0xe8] sm:$0xff] }
 0xbcb   : > { %1746 = vmatmul.msk.f32.vlgmr.msrb.gmra.mxu1 %vm657_vm1, %v1180_v9 }
 0xbd3   : > { %1751 = vmatmul.msk.f32.vlgmr.msra.gmra.mxu1 %vm657_vm1, %v1273_v10 }
 0xbd9   : > { %v1338_v17 = vpop.permute.xlu1 %1337 }
 0xbdf   : > { %v1243_v12 = vpop.xlane.xlu2 %1242 }
 0xbe0   : > { %1894 = vrcp.f32 %v1243_v12  ;;  %v1782_v12 = vld [vmem:[%s2579_s12 + $0xe0] sm:$0xff] }
 0xbe6   : > { %v1895_v13 = vpop.eup %1894 }
 0xbe7   : > { %v1245_v14 = vmul.f32 %v1895_v13, %v1891_v3  ;;  %v1247_v15 = vpop.permute.xlu2 %1246  ;;  %v1767_v3 = vld [vmem:[%s2577_s10 + $0x38] sm:$0xff] }
 0xbe8   : > { %1267 = vmatpush.msrb.mxu0 %v1247_v15  ;;  %v1780_v15 = vld [vmem:[%s2579_s12 + $0xd0] sm:$0xff] }
 0xbe9   : > { %1749 = vmatmul.msk.f32.vlgmr.msrb.gmra.mxu0 %vm657_vm1, %v1245_v14  ;;  %v1781_v14 = vld [vmem:[%s2579_s12 + $0xd8] sm:$0xff] }
 0xbea   : > { %1753 = vmatpush.xpose.msk.msra.mxu0 %vm657_vm1, %v1340_v16  ;;  %v1779_v16 = vld [vmem:[%s2579_s12 + $0xc8] sm:$0xff] }
 0xbee   : > { %1510 = vmatpush.msrb.mxu0 %v1767_v3 }
 0xbf1   : > { %1754 = vmatmul.msk.f32.vlgmr.msra.gmra.mxu0 %vm657_vm1, %v1338_v17  ;;  %v1778_v17 = vld [vmem:[%s2579_s12 + $0xc0] sm:$0xff] }
 0xc48   : > { %v1204_v18 = vpop.f32.mrf.mxu1 }
 0xc50   : > { %v1297_v19 = vpop.f32.mrf.mxu1 }
 0xc51   : > { %v1298_v20 = vadd.f32 %v1297_v19, %v2199_v23  ;;  %v1777_v19 = vld [vmem:[%s2579_s12 + $0xb8] sm:$0xff] }
 0xc53   : > { %v1300_v21 = vsel %vm657_vm1, %v1298_v20, -inf }
 0xc54   : > { %1301 = vmax.xlane.f32.xlu2 %v1300_v21  ;;  %v1776_v21 = vld [vmem:[%s2579_s12 + $0xb0] sm:$0xff] }
 0xc66   : > { %v1269_v22 = vpop.f32.mrf.mxu0 }
 0xc6e   : > { %v1362_v24 = vpop.f32.mrf.mxu0 }
 0xc6f   : > { %v1363_v25 = vadd.f32 %v1362_v24, %v2199_v23  ;;  %v1775_v24 = vld [vmem:[%s2579_s12 + $0xa8] sm:$0xff] }
 0xc71   : > { %v1365_v26 = vsel %vm657_vm1, %v1363_v25, -inf }
 0xc72   : > { %1366 = vmax.xlane.f32.xlu0 %v1365_v26  ;;  %v1774_v26 = vld [vmem:[%s2579_s12 + $0xa0] sm:$0xff] }
 0xc86   : > { %1311 = vrot.lane.b32.xlu0 %v2362_v48, %s2629_s22  ;;  %s1641_s22 = sshll.u32 %s579_s27, 4  ;;  %s1642_s22 = int_to_ptr.vmem [resolvable:$true] %s1641_s22 }
 0xcc7   : > { %v1302_v27 = vpop.xlane.xlu2 %1301 }
 0xcc8   : > { %v1303_v28 = vsub.f32 %v1298_v20, %v1302_v27 }
 0xcca   : > { %v1304_v29 = vmul.f32 1.442695, %v1303_v28  ;;  %v1773_v28 = vld [vmem:[%s2579_s12 + $0x98] sm:$0xff] }
 0xccc   : > { %1896 = vpow2.f32 %v1304_v29 }
 0xcd2   : > { %v1897_v30 = vpop.eup %1896 }
 0xcd3   : > { %v1306_v31 = vsel %vm657_vm1, %v1897_v30, 0.0 }
 0xcd4   : > { %1307 = vadd.xlane.f32.xlu1 %v1306_v31 }
 0xce5   : > { %v1367_v32 = vpop.xlane.xlu0 %1366 }
 0xce6   : > { %v1368_v33 = vsub.f32 %v1363_v25, %v1367_v32 }
 0xce8   : > { %v1369_v34 = vmul.f32 1.442695, %v1368_v33  ;;  %v1860_v33 = vld [vmem:[%s2576_s9 + $0x1] ss:$0 sm:$0xff] }
 0xcea   : > { %1898 = vpow2.f32 %v1369_v34 }
 0xced   : > { %1376 = vrot.lane.b32.xlu1 %v2362_v48, %s2630_s20  ;;  %s1643_s20 = sshll.u32 %s1639_s26, 4  ;;  %s1644_s20 = int_to_ptr.hbm [resolvable:$true] %s1643_s20 }
 0xcee   : > { %s1922_s0 = sshra.s32 %s1644_s20, 4  ;;  %s1923_s0 = int_to_ptr.hbm [resolvable:$true] %s1922_s0 }
 0xcef   : > { %s1924_s3 = scalar_lea.hbm %s1923_s0, 8  ;;  %p1929_p0 = scmp.lt.s32.totalorder %s1923_s0, %s2585_s18 }
 0xcf0   : > { %v1899_v23 = vpop.eup %1898  ;;  %p1925_p11 = scmp.ne.s32.totalorder %s1923_s0, %s1924_s3  ;;  %p1930_p1 = scmp.lt.s32.totalorder %s1928_s24, %s1924_s3 }
 0xcf1   : > { %v1371_v36 = vsel %vm657_vm1, %v1899_v23, 0.0 }
 0xcf2   : > { %1372 = vadd.xlane.f32.xlu2 %v1371_v36  ;;  %v1772_v36 = vld [vmem:[%s2579_s12 + $0x90] sm:$0xff]  ;;  %p1926_p12 = pnand %p1925_p11, %p2120_p5  ;;  %p1931_p2 = por %p1930_p1, %p1929_p0 }
 0xcf4   : > { %p1927_p13 = pneg %p1926_p12 }
 0xcf6   : > { %p1932_p3 = pnand %p1931_p2, %p1927_p13 }
 0xcf8   : > { %v1312_v37 = vpop.permute.xlu0 %1311 }
 0xcf9   : > { %1332 = vmatpush.msra.mxu2 %v1312_v37  ;;  %v1771_v37 = vld [vmem:[%s2579_s12 + $0x88] sm:$0xff] }
 0xcfb   : > { %1442 = vmatpush.msrb.mxu2 %v1759_v44 }
 0xcfd   : > { %1443 = vmatpush.msrb.mxu2 %v1758_v46 }
 0xcff   : > { %1444 = vmatpush.msrb.mxu2 %v1757_v47 }
 0xd01   : > { %1445 = vmatpush.msrb.mxu2 %v1756_v50 }
 0xd0a   : > { %1403 = vrot.lane.b32.xlu2 %v1269_v22, %s2631_s23  ;;  %s1629_s23 = scalar_lea.sflag [#allocation3], %s577_s25 }
 0xd47   : > { %v1308_v38 = vpop.xlane.xlu1 %1307 }
 0xd48   : > { %1900 = vrcp.f32 %v1308_v38  ;;  %v1770_v38 = vld [vmem:[%s2579_s12 + $0x80] sm:$0xff] }
 0xd4e   : > { %v1901_v39 = vpop.eup %1900 }
 0xd4f   : > { %v1310_v11 = vmul.f32 %v1901_v39, %v1897_v30  ;;  %v1859_v30 = vld [vmem:[%s2575_s8 + $0x1] ss:$0 sm:$0xff] }
 0xd50   : > { %v1861_v39 = vld [vmem:[%s2578_s11 + $0x1] ss:$0 sm:$0xff] }
 0xd51   : > { %1752 = vmatmul.msk.f32.vlgmr.msra.gmra.mxu2 %vm657_vm1, %v1310_v11 }
 0xd5f   : > { %v1377_v40 = vpop.permute.xlu1 %1376 }
 0xd60   : > { %1397 = vmatpush.msrb.mxu1 %v1377_v40 }
 0xd62   : > { %1541 = vmatpush.msra.mxu1 %v1785_v6  ;;  %v1865_v6 = vld [vmem:[%s2584_s17] ss:$0 sm:$0xff] }
 0xd64   : > { %1542 = vmatpush.msra.mxu1 %v1784_v7 }
 0xd65   : > { %v1373_v41 = vpop.xlane.xlu2 %1372 }
 0xd66   : > { %1902 = vrcp.f32 %v1373_v41  ;;  %1543 = vmatpush.msra.mxu1 %v1783_v8 }
 0xd68   : > { %1544 = vmatpush.msra.mxu1 %v1782_v12 }
 0xd6a   : > { %1545 = vmatpush.msra.mxu1 %v1781_v14 }
 0xd6c   : > { %v1903_v42 = vpop.eup %1902  ;;  %1546 = vmatpush.msra.mxu1 %v1780_v15 }
 0xd6d   : > { %v1375_v43 = vmul.f32 %v1903_v42, %v1899_v23  ;;  %v1404_v51 = vpop.permute.xlu2 %1403  ;;  %v1862_v42 = vld [vmem:[%s2580_s13 + $0x1] ss:$0 sm:$0xff] }
 0xd6e   : > { %v1414_v52 = vsel %vm657_vm1, %v1204_v18, %v1404_v51  ;;  %1547 = vmatpush.msra.mxu1 %v1779_v16 }
 0xd6f   : > { %1755 = vmatmul.msk.f32.vlgmr.msrb.gmra.mxu1 %vm657_vm1, %v1375_v43 }
 0xd70   : > { %1548 = vmatpush.msra.mxu1 %v1778_v17 }
 0xd72   : > { %1549 = vmatpush.msra.mxu1 %v1777_v19 }
 0xd74   : > { %1550 = vmatpush.msra.mxu1 %v1776_v21 }
 0xd76   : > { %1551 = vmatpush.msra.mxu1 %v1775_v24 }
 0xd78   : > { %1552 = vmatpush.msra.mxu1 %v1774_v26 }
 0xd7a   : > { %1553 = vmatpush.msra.mxu1 %v1773_v28 }
 0xd7c   : > { %1554 = vmatpush.msra.mxu1 %v1772_v36 }
 0xd7e   : > { %1555 = vmatpush.msra.mxu1 %v1771_v37 }
 0xd80   : > { %1556 = vmatpush.msra.mxu1 %v1770_v38 }
 0xdd4   : > { %v1334_v48 = vpop.f32.mrf.mxu2 }
 0xdd5   : > { %1407 = vrot.lane.b32.xlu0 %v1334_v48, %s2632_s29 }
 0xdec   : > { %v1399_v49 = vpop.f32.mrf.mxu1 }
 0xded   : > { %1411 = vrot.lane.b32.xlu2 %v1399_v49, %s2633_s1 }
 0xe47   : > { %v1408_v53 = vpop.permute.xlu0 %1407  ;;  %v1412_v54 = vpop.permute.xlu2 %1411 }
 0xe48   : > { %v1415_v55 = vsel %vm928_vm2, %v1414_v52, %v1408_v53  ;;  %v1599_v53 = vld [vmem:[%s2583_s16 + $0x18] sm:$0xff] }
 0xe49   : > { %v1416_v56 = vsel %vm930_vm3, %v1415_v55, %v1412_v54  ;;  %1619 = vmatpush.msra.mxu3 %v1599_v53  ;;  %v1598_v54 = vld [vmem:[%s2583_s16 + $0x10] sm:$0xff]  ;;  %v1597_v55 = vld [vmem:[%s2583_s16 + $0x8] sm:$0xff] }
 0xe4a   : > { %1761 = vmatmul.msk.f32.vlgmr.msrb.gmra.mxu2 %vm598_vm0, %v1416_v56  ;;  %v1596_v56 = vld [vmem:[%s2583_s16] sm:$0xff] }
 0xe4b   : > { %1620 = vmatpush.msra.mxu3 %v1598_v54 }
 0xe4d   : > { %1621 = vmatpush.msra.mxu3 %v1597_v55 }
 0xe4f   : > { %1622 = vmatpush.msra.mxu3 %v1596_v56 }
 0xecd   : > { %v1447_v58 = vpop.f32.mrf.mxu2 }
 0xece   : > { %v1448_v59 = vadd.f32 %v1858_v57, %v1447_v58 }
 0xed0   : > { %v1450_v60 = vadd.f32 %v1448_v59, %v2355_v45  ;;  %v1766_v45 = vld [vmem:[%s2577_s10 + $0x30] sm:$0xff] }
 0xed1   : > { %1511 = vmatpush.msrb.mxu0 %v1766_v45 }
 0xed2   : > { %v1455_v61 = vsel %vm598_vm0, %v1450_v60, 0.0 }
 0xed3   : > { %1456 = vadd.xlane.f32.xlu1 %v1455_v61  ;;  %1512 = vmatpush.msrb.mxu0 %v1765_v4 }
 0xed5   : > { %1513 = vmatpush.msrb.mxu0 %v1764_v5 }
 0xf46   : > { %v1457_v62 = vpop.xlane.xlu1 %1456 }
 0xf47   : > { %v1458_v63 = vmul.f32 %v1457_v62, %v2255_v35 }
 0xf49   : > { %v1459_v0 = vsub.f32 %v1450_v60, %v1458_v63 }
 0xf4b   : > { %v1460_v1 = vmul.f32 %v1459_v0, %v1459_v0 }
 0xf4d   : > { %v1461_v2 = vsel %vm598_vm0, %v1460_v1, 0.0 }
 0xf4e   : > { %1462 = vadd.xlane.f32.xlu0 %v1461_v2  ;;  %v1863_v2 = vld [vmem:[%s2581_s14 + $0x1] ss:$0 sm:$0xff] }
 0xfc1   : > { %v1463_v9 = vpop.xlane.xlu0 %1462 }
 0xfc2   : > { %v1464_v10 = vmul.f32 %v1463_v9, %v2255_v35 }
 0xfc4   : > { %v1465_v13 = vadd.f32 1e-05, %v1464_v10 }
 0xfc6   : > { %1904 = vrsqrt.f32 %v1465_v13  ;;  %vm1472_vm12 = vweird.f32 %v1465_v13 }
 0xfcc   : > { %v1905_v18 = vpop.eup %1904 }
 0xfcd   : > { %v1467_v20 = vmul.f32 %v1905_v18, %v1465_v13  ;;  %vm1473_vm11 = vweird.f32 %v1905_v18 }
 0xfce   : > { %vm1474_vm13 = vmor %vm1472_vm12, %vm1473_vm11 }
 0xfcf   : > { %v1468_v22 = vmul.f32 %v1905_v18, %v1467_v20 }
 0xfd1   : > { %v1469_v25 = vmul.f32 0.5, %v1468_v22 }
 0xfd3   : > { %v1470_v27 = vsub.f32 1.5, %v1469_v25 }
 0xfd5   : > { %v1471_v29 = vmul.f32 %v1905_v18, %v1470_v27 }
 0xfd7   : > { %v1475_v31 = vsel %vm1474_vm13, %v1905_v18, %v1471_v29 }
 0xfd8   : > { %v1476_v32 = vmul.f32 %v1475_v31, %v1459_v0 }
 0xfda   : > { %v1480_v34 = vmul.f32 %v1859_v30, %v1476_v32 }
 0xfdc   : > { %v1484_v23 = vadd.f32 %v1860_v33, %v1480_v34 }
 0xfde   : > { %1769 = vmatmul.msk.f32.vlgmr.msrb.gmra.mxu0 %vm598_vm0, %v1484_v23 }
0x105b   : > { %v1515_v11 = vpop.f32.mrf.mxu0 }
0x105c   : > { %v1516_v40 = vadd.f32 %v1861_v39, %v1515_v11 }
0x105e   : > { %v1518_v41 = vmax.f32 %v1516_v40, 0.0 }
0x1060   : > { %1557 = vmatmul.f32.vlgmr.msra.gmra.mxu1 %v1518_v41 }
0x10dd   : > { %v1558_v43 = vpop.f32.mrf.mxu1 }
0x10de   : > { %v1559_v44 = vadd.f32 %v1862_v42, %v1558_v43 }
0x10e0   : > { %v1561_v46 = vadd.f32 %v1559_v44, %v1484_v23 }
0x10e2   : > { %v1566_v47 = vsel %vm598_vm0, %v1561_v46, 0.0 }
0x10e3   : > { %1567 = vadd.xlane.f32.xlu2 %v1566_v47 }
0x1156   : > { %v1568_v48 = vpop.xlane.xlu2 %1567 }
0x1157   : > { %v1569_v49 = vmul.f32 %v1568_v48, %v2255_v35 }
0x1159   : > { %v1570_v50 = vsub.f32 %v1561_v46, %v1569_v49 }
0x115b   : > { %v1571_v51 = vmul.f32 %v1570_v50, %v1570_v50 }
0x115d   : > { %v1572_v52 = vsel %vm598_vm0, %v1571_v51, 0.0 }
0x115e   : > { %1573 = vadd.xlane.f32.xlu1 %v1572_v52 }
0x11d1   : > { %v1574_v57 = vpop.xlane.xlu1 %1573 }
0x11d2   : > { %v1575_v58 = vmul.f32 %v1574_v57, %v2255_v35  ;;  %v1864_v35 = vld [vmem:[%s2582_s15 + $0x1] ss:$0 sm:$0xff] }
0x11d4   : > { %v1576_v59 = vadd.f32 1e-05, %v1575_v58 }
0x11d6   : > { %1906 = vrsqrt.f32 %v1576_v59  ;;  %vm1583_vm15 = vweird.f32 %v1576_v59 }
0x11dc   : > { %v1907_v60 = vpop.eup %1906 }
0x11dd   : > { %v1578_v61 = vmul.f32 %v1907_v60, %v1576_v59  ;;  %vm1584_vm14 = vweird.f32 %v1907_v60 }
0x11de   : > { %vm1585_vm1 = vmor %vm1583_vm15, %vm1584_vm14 }
0x11df   : > { %v1579_v62 = vmul.f32 %v1907_v60, %v1578_v61 }
0x11e1   : > { %v1580_v63 = vmul.f32 0.5, %v1579_v62 }
0x11e3   : > { %v1581_v0 = vsub.f32 1.5, %v1580_v63 }
0x11e5   : > { %v1582_v1 = vmul.f32 %v1907_v60, %v1581_v0 }
0x11e7   : > { %v1586_v3 = vsel %vm1585_vm1, %v1907_v60, %v1582_v1 }
0x11e8   : > { %v1587_v45 = vmul.f32 %v1586_v3, %v1570_v50 }
0x11ea   : > { %v1591_v4 = vmul.f32 %v1863_v2, %v1587_v45 }
0x11ec   : > { %v1595_v5 = vadd.f32 %v1864_v35, %v1591_v4 }
0x11ee   : > { %1789 = vmatmul.msk.f32.vlgmr.msra.gmra.mxu3 %vm598_vm0, %v1595_v5 }
0x1271   : > { %v1624_v7 = vpop.f32.mrf.mxu3 }
0x1272   : > { %v1625_v8 = vadd.f32 %v1865_v6, %v1624_v7 }
0x1274   : > { %1627 = vst.msk [vmem:[%s579_s27] sm:$0xff] %vm598_vm0, %v1625_v8 }
0x1275   : > { %1935 = shalt.err (!%p1932_p3)
}
0x1276   : > { %1794 = dma.vmem_to_hbm [thread:$0]  (%p2120_p5), %s1642_s22, 128, %s1644_s20, %s1629_s23  }
0x1277 PF: > { %s2634_s25 = sld [smem:[#allocation7_spill]] }
0x1278   : > { %s2635_s29 = sld [smem:[#allocation5_spill]] }
0x127d   : > { %p1800_p4 = scmp.ge.s32.totalorder %s2634_s25, 2 }
0x127e   : > { %s1655_s27 = sand.u32 1, %s2635_s29  }
0x127f   : > { %p1797_p7 = pnand %p1800_p4, %p2124_p6  ;;  %s1656_s21 = scalar_lea.sflag [#allocation3], %s1655_s27 }
0x1281   : > { %p1798_p8 = pneg %p1797_p7 }
0x1283   : > { %1953 = dma.done.wait (%p1798_p8), %s1656_s21, 128  }
0x1284   : > { %1955 = vsyncadd (%p1798_p8), %s1656_s21, 4294967168  ;;  %s2637_s30 = sld [smem:[#allocation8_spill]]  ;;  %s2640_s27 = smov %s1962_s28 }
0x1285   : > { %s2638_s3 = sld [smem:[#allocation6_spill]] }
0x1286   : > { %s2639_s29 = sld [smem:[#allocation9_spill]] }
0x128a   : > { %p28_p9 = scmp.ge.s32.totalorder %s2637_s30, 4  }
0x128b   : > { %s2641_s28 = smov %s2638_s3 }
0x128c   :  { %30 = sbr.rel (!%p28_p9) target bundleno = 8 (0x8), region = 142 }
0x1291   :  { %1662 = vsyncpa [#allocation3], 1 }
0x1292   :  { %1664 = vsyncpa [#allocation3 + $0x1], 1 }

</bundles_post_ra>
